<compile_context>
chip_gen: v6e
topology: v6e:2x2x1
jax: 0.10.0
libtpu: 0.0.40
codegen_flags: <defaults>
</compile_context>

<pallas_src>
import functools
import math

import jax
import jax.numpy as jnp
from jax.experimental import pallas as pl
from jax.experimental.pallas import tpu as pltpu

_VMEM_LIMIT = 64 * 1024 * 1024


def _round_up(x, m):
    return ((x + m - 1) // m) * m


def _pick_tile(dim, max_tile):
    """Full-dim block when it fits (no padding); otherwise tile + pad."""
    if dim <= max_tile:
        return dim, dim
    return max_tile, _round_up(dim, max_tile)


# ----------------------------------------------------------------------------
# Tiled linear:  y = x @ w + b  (optionally ReLU).  bf16 MXU inputs, f32 acc.
# ----------------------------------------------------------------------------
def _matmul_kernel(x_ref, w_ref, b_ref, o_ref, acc_ref, *, relu):
    k = pl.program_id(2)

    @pl.when(k == 0)
    def _():
        acc_ref[...] = jnp.zeros_like(acc_ref)

    acc_ref[...] += jnp.dot(x_ref[...], w_ref[...],
                            preferred_element_type=jnp.float32)

    @pl.when(k == pl.num_programs(2) - 1)
    def _():
        y = acc_ref[...] + b_ref[...]
        if relu:
            y = jnp.maximum(y, 0.0)
        o_ref[...] = y.astype(o_ref.dtype)


def linear(x, w, b, *, relu=False, out_dtype=jnp.bfloat16):
    """x: (M, K), w: (K, N) bf16, b: (N,) f32 -> (M, N) out_dtype."""
    M, K = x.shape
    N = w.shape[1]
    tm, Mp = _pick_tile(M, 512)
    tk, Kp = _pick_tile(K, 1024)
    tn, Np = _pick_tile(N, 512)

    xb = x.astype(jnp.bfloat16)
    wb = w.astype(jnp.bfloat16)
    bb = b.astype(jnp.float32).reshape(1, N)
    if Mp != M or Kp != K:
        xb = jnp.pad(xb, ((0, Mp - M), (0, Kp - K)))
    if Kp != K or Np != N:
        wb = jnp.pad(wb, ((0, Kp - K), (0, Np - N)))
    if Np != N:
        bb = jnp.pad(bb, ((0, 0), (0, Np - N)))

    grid = (Mp // tm, Np // tn, Kp // tk)
    out = pl.pallas_call(
        functools.partial(_matmul_kernel, relu=relu),
        out_shape=jax.ShapeDtypeStruct((Mp, Np), out_dtype),
        grid=grid,
        in_specs=[
            pl.BlockSpec((tm, tk), lambda i, j, k: (i, k)),
            pl.BlockSpec((tk, tn), lambda i, j, k: (k, j)),
            pl.BlockSpec((1, tn), lambda i, j, k: (0, j)),   # bias resident over k
        ],
        out_specs=pl.BlockSpec((tm, tn), lambda i, j, k: (i, j)),
        scratch_shapes=[pltpu.VMEM((tm, tn), jnp.float32)],
        compiler_params=pltpu.CompilerParams(
            dimension_semantics=("parallel", "parallel", "arbitrary"),
            vmem_limit_bytes=_VMEM_LIMIT),
    )(xb, wb, bb)

    if Mp != M or Np != N:
        out = out[:M, :N]
    return out


# ----------------------------------------------------------------------------
# Fused linear + residual-add + LayerNorm (output projection path).
# Requires the full feature dim D as the output tile (LN needs whole rows).
# ----------------------------------------------------------------------------
def _matmul_add_ln_kernel(x_ref, w_ref, b_ref, res_ref, g_ref, bt_ref, o_ref, acc_ref):
    k = pl.program_id(1)

    @pl.when(k == 0)
    def _():
        acc_ref[...] = jnp.zeros_like(acc_ref)

    acc_ref[...] += jnp.dot(x_ref[...], w_ref[...],
                            preferred_element_type=jnp.float32)

    @pl.when(k == pl.num_programs(1) - 1)
    def _():
        y = acc_ref[...] + b_ref[...] + res_ref[...].astype(jnp.float32)
        mean = jnp.mean(y, axis=-1, keepdims=True)
        var = jnp.mean(jnp.square(y - mean), axis=-1, keepdims=True)
        o_ref[...] = ((y - mean) * jax.lax.rsqrt(var + 1e-5) * g_ref[...]
                      + bt_ref[...]).astype(o_ref.dtype)


def linear_add_ln(x, w, b, res, gamma, beta, *, out_dtype=jnp.bfloat16):
    """LayerNorm(res + x @ w + b).  x: (M, K), w: (K, D), res: (M, D)."""
    M, K = x.shape
    D = w.shape[1]
    tm, Mp = _pick_tile(M, 512)
    tk, Kp = _pick_tile(K, 1024)

    xb = x.astype(jnp.bfloat16)
    rb = res.astype(jnp.bfloat16)
    if Mp != M or Kp != K:
        xb = jnp.pad(xb, ((0, Mp - M), (0, Kp - K)))
    if Mp != M:
        rb = jnp.pad(rb, ((0, Mp - M), (0, 0)))

    grid = (Mp // tm, Kp // tk)
    out = pl.pallas_call(
        _matmul_add_ln_kernel,
        out_shape=jax.ShapeDtypeStruct((Mp, D), out_dtype),
        grid=grid,
        in_specs=[
            pl.BlockSpec((tm, tk), lambda i, k: (i, k)),
            pl.BlockSpec((tk, D), lambda i, k: (k, 0)),
            pl.BlockSpec((1, D), lambda i, k: (0, 0)),
            pl.BlockSpec((tm, D), lambda i, k: (i, 0)),
            pl.BlockSpec((1, D), lambda i, k: (0, 0)),
            pl.BlockSpec((1, D), lambda i, k: (0, 0)),
        ],
        out_specs=pl.BlockSpec((tm, D), lambda i, k: (i, 0)),
        scratch_shapes=[pltpu.VMEM((tm, D), jnp.float32)],
        compiler_params=pltpu.CompilerParams(
            dimension_semantics=("parallel", "arbitrary"),
            vmem_limit_bytes=_VMEM_LIMIT),
    )(xb, w.astype(jnp.bfloat16), b.astype(jnp.float32).reshape(1, D), rb,
      gamma.reshape(1, D), beta.reshape(1, D))
    return out[:M] if Mp != M else out


# ----------------------------------------------------------------------------
# Fused FFN: LayerNorm(x + relu(x@W1+b1)@W2 + b2) — hidden never touches HBM.
# ----------------------------------------------------------------------------
def _ffn_add_ln_kernel(x_ref, w1_ref, b1_ref, w2_ref, b2_ref, g_ref, bt_ref, o_ref):
    x = x_ref[...]                                               # (tm, D) bf16
    h = jnp.dot(x, w1_ref[...], preferred_element_type=jnp.float32) + b1_ref[...]
    h = jnp.maximum(h, 0.0).astype(jnp.bfloat16)                 # (tm, F) stays in VMEM
    y = jnp.dot(h, w2_ref[...], preferred_element_type=jnp.float32) + b2_ref[...]
    y = y + x.astype(jnp.float32)                                # residual
    mean = jnp.mean(y, axis=-1, keepdims=True)
    var = jnp.mean(jnp.square(y - mean), axis=-1, keepdims=True)
    o_ref[...] = ((y - mean) * jax.lax.rsqrt(var + 1e-5) * g_ref[...]
                  + bt_ref[...]).astype(o_ref.dtype)


def ffn_add_ln(x, w1, b1, w2, b2, gamma, beta, *, out_dtype=jnp.bfloat16):
    M, D = x.shape
    F = w1.shape[1]
    tm, Mp = _pick_tile(M, 256)
    xb = x.astype(jnp.bfloat16)
    if Mp != M:
        xb = jnp.pad(xb, ((0, Mp - M), (0, 0)))

    out = pl.pallas_call(
        _ffn_add_ln_kernel,
        out_shape=jax.ShapeDtypeStruct((Mp, D), out_dtype),
        grid=(Mp // tm,),
        in_specs=[
            pl.BlockSpec((tm, D), lambda i: (i, 0)),
            pl.BlockSpec((D, F), lambda i: (0, 0)),
            pl.BlockSpec((1, F), lambda i: (0, 0)),
            pl.BlockSpec((F, D), lambda i: (0, 0)),
            pl.BlockSpec((1, D), lambda i: (0, 0)),
            pl.BlockSpec((1, D), lambda i: (0, 0)),
            pl.BlockSpec((1, D), lambda i: (0, 0)),
        ],
        out_specs=pl.BlockSpec((tm, D), lambda i: (i, 0)),
        compiler_params=pltpu.CompilerParams(
            dimension_semantics=("parallel",),
            vmem_limit_bytes=_VMEM_LIMIT),
    )(xb,
      w1.astype(jnp.bfloat16), b1.astype(jnp.float32).reshape(1, F),
      w2.astype(jnp.bfloat16), b2.astype(jnp.float32).reshape(1, D),
      gamma.reshape(1, D), beta.reshape(1, D))
    return out[:M] if Mp != M else out


# ----------------------------------------------------------------------------
# Attention: grid over (batch, head); 2-D (S, dh) blocks with dh as the full
# last dim; q/k/v picked out of the fused projection tensor by the BlockSpec
# leading-axis index; mask built in-kernel; scale pre-folded into the Q weights.
# ----------------------------------------------------------------------------
def _attn_kernel(q_ref, k_ref, v_ref, kpm_ref, o_ref, *, causal):
    q = q_ref[0, 0, 0]                                  # (Sq, dh) bf16 (pre-scaled)
    k = k_ref[0, 0, 0]                                  # (Sk, dh) bf16
    v = v_ref[0, 0, 0]                                  # (Sk, dh) bf16
    Sq = q.shape[0]
    Sk = k.shape[0]

    kpm = kpm_ref[0]                                    # (1, Sk) f32, 1 = masked key
    mask = jnp.broadcast_to(kpm * jnp.float32(-1e9), (Sq, Sk))
    if causal:
        row = jax.lax.broadcasted_iota(jnp.int32, (Sq, Sk), 0)
        col = jax.lax.broadcasted_iota(jnp.int32, (Sq, Sk), 1)
        mask = mask + jnp.where(col > row, jnp.float32(-1e9), jnp.float32(0.0))

    s = jax.lax.dot_general(q, k, (((1,), (1,)), ((), ())),
                            preferred_element_type=jnp.float32) + mask
    m = jnp.max(s, axis=-1, keepdims=True)
    p = jnp.exp(s - m)                                  # f32 softmax (v5e-safe)
    l = jnp.sum(p, axis=-1, keepdims=True)
    o = jnp.dot(p.astype(v.dtype), v, preferred_element_type=jnp.float32)
    o_ref[0, 0] = (o * pl.reciprocal(l, approx=True)).astype(o_ref.dtype)


def _leading_idx_map(slot):
    return lambda b, h: (slot, b, h, 0, 0)


def attention(qa, ka, va, kpm_f, *, iq, ik, iv, causal):
    """qa/ka/va: (n, B, H, S, dh) bf16 (possibly the same fused tensor);
    iq/ik/iv select the leading-axis slot for q/k/v.  kpm_f: (B,1,Sk) f32."""
    _, B, H, Sq, dh = qa.shape
    Sk = ka.shape[3]
    return pl.pallas_call(
        functools.partial(_attn_kernel, causal=causal),
        out_shape=jax.ShapeDtypeStruct((B, H, Sq, dh), jnp.bfloat16),
        grid=(B, H),
        in_specs=[
            pl.BlockSpec((1, 1, 1, Sq, dh), _leading_idx_map(iq)),
            pl.BlockSpec((1, 1, 1, Sk, dh), _leading_idx_map(ik)),
            pl.BlockSpec((1, 1, 1, Sk, dh), _leading_idx_map(iv)),
            pl.BlockSpec((1, 1, Sk), lambda b, h: (b, 0, 0)),
        ],
        out_specs=pl.BlockSpec((1, 1, Sq, dh), lambda b, h: (b, h, 0, 0)),
        compiler_params=pltpu.CompilerParams(
            dimension_semantics=("parallel", "parallel"),
            vmem_limit_bytes=_VMEM_LIMIT),
    )(qa, ka, va, kpm_f)


# ----------------------------------------------------------------------------
# Plain-JAX glue (embeddings, positional encoding, head-major reshapes)
# ----------------------------------------------------------------------------
def sinusoidal_pe(length, d_model):
    assert d_model % 2 == 0, "sinusoidal PE assumes even d_model"
    pos = jnp.arange(length, dtype=jnp.float32)[:, None]
    i = jnp.arange(0, d_model, 2, dtype=jnp.float32)
    angle = pos / jnp.power(10000.0, i / d_model)
    pe = jnp.zeros((length, d_model), jnp.float32)
    pe = pe.at[:, 0::2].set(jnp.sin(angle))
    pe = pe.at[:, 1::2].set(jnp.cos(angle))
    return pe


def self_attn_block(x, kpm_f, causal, p, ln, heads):
    B, S, D = x.shape
    dh = D // heads
    xf = x.reshape(B * S, D)
    qkv = linear(xf, p['qkv']['w'], p['qkv']['b'])                   # (B*S, 3D) bf16
    qkv5 = qkv.reshape(B, S, 3, heads, dh).transpose(2, 0, 3, 1, 4)  # (3,B,H,S,dh)
    o = attention(qkv5, qkv5, qkv5, kpm_f, iq=0, ik=1, iv=2, causal=causal)
    of = o.transpose(0, 2, 1, 3).reshape(B * S, D)
    y = linear_add_ln(of, p['o']['w'], p['o']['b'], xf, ln[0], ln[1])
    return y.reshape(B, S, D)


def cross_attn_block(x_q, x_kv, kpm_f, p, ln, heads):
    B, Tq, D = x_q.shape
    Sk = x_kv.shape[1]
    dh = D // heads
    xqf = x_q.reshape(B * Tq, D)
    q = linear(xqf, p['q']['w'], p['q']['b'])                        # (B*Tq, D) bf16
    kv = linear(x_kv.reshape(B * Sk, D), p['kv']['w'], p['kv']['b']) # (B*Sk, 2D) bf16
    q5 = q.reshape(B, Tq, heads, dh).transpose(0, 2, 1, 3).reshape(1, B, heads, Tq, dh)
    kv5 = kv.reshape(B, Sk, 2, heads, dh).transpose(2, 0, 3, 1, 4)   # (2,B,H,Sk,dh)
    o = attention(q5, kv5, kv5, kpm_f, iq=0, ik=0, iv=1, causal=False)
    of = o.transpose(0, 2, 1, 3).reshape(B * Tq, D)
    y = linear_add_ln(of, p['o']['w'], p['o']['b'], xqf, ln[0], ln[1])
    return y.reshape(B, Tq, D)


def ffn_block(x, ff1, ff2, ln):
    B, S, D = x.shape
    y = ffn_add_ln(x.reshape(B * S, D), ff1['w'], ff1['b'], ff2['w'], ff2['b'],
                   ln[0], ln[1])
    return y.reshape(B, S, D)


def encoder_forward(src_ids, src_kpm_f, params, heads):
    B, S = src_ids.shape
    D = params['emb'].shape[1]
    x = (params['emb'][src_ids] + sinusoidal_pe(S, D)[None]).astype(jnp.bfloat16)
    for lp in params['enc_layers']:
        x = self_attn_block(x, src_kpm_f, False, lp['attn'], lp['ln1'], heads)
        x = ffn_block(x, lp['ff1'], lp['ff2'], lp['ln2'])
    return x


def decoder_forward(mels, enc_out, tgt_kpm_f, src_kpm_f, params, heads):
    B, T, n_mels = mels.shape
    D = params['emb'].shape[1]
    x = linear(mels.reshape(B * T, n_mels),
               params['prenet']['w'], params['prenet']['b'])
    x = (x.astype(jnp.float32).reshape(B, T, D)
         + sinusoidal_pe(T, D)[None]).astype(jnp.bfloat16)
    for lp in params['dec_layers']:
        x = self_attn_block(x, tgt_kpm_f, True, lp['self_attn'], lp['ln1'], heads)
        x = cross_attn_block(x, enc_out, src_kpm_f, lp['cross_attn'], lp['ln2'], heads)
        x = ffn_block(x, lp['ff1'], lp['ff2'], lp['ln3'])
    return x


def transformer_forward(params, src, mels_input, mel_lens, *, heads):
    B, S = src.shape
    T = mels_input.shape[1]

    # src_key_padding_mask = (src == 0), passed as a tiny (B,1,S) float vector;
    # the additive (Sq,Sk) mask is built inside the attention kernel.
    src_kpm_f = (src == 0).astype(jnp.float32).reshape(B, 1, S)
    enc_out = encoder_forward(src, src_kpm_f, params, heads)

    # generate_tgt_mask: key padding from mel_lens; causal part built in-kernel.
    tgt_kpm_f = (jnp.arange(T)[None, :] >= mel_lens[:, None]
                 ).astype(jnp.float32).reshape(B, 1, T)

    dec_out = decoder_forward(mels_input, enc_out, tgt_kpm_f, src_kpm_f,
                              params, heads)
    D = dec_out.shape[-1]
    flat = dec_out.reshape(B * T, D)

    # Fused fc_out + gate: one matmul with a (D, tgt_vocab+1) weight, f32 output.
    head_out = linear(flat, params['head']['w'], params['head']['b'],
                      out_dtype=jnp.float32)
    tgt_vocab = params['head']['w'].shape[1] - 1
    mel_logits = head_out[:, :tgt_vocab].reshape(B, T, tgt_vocab)
    gate_logits = head_out[:, tgt_vocab].reshape(B, T)                # squeeze(-1)
    return mel_logits, gate_logits


# ----------------------------------------------------------------------------
# Deterministic parameter initialization.  Matmul weights stored bf16 (one-time
# cast), biases/LN params f32.  1/sqrt(dh) folded into the Q columns of the
# fused QKV projection and the cross-attention Q projection.
# ----------------------------------------------------------------------------
def init_params(key, src_vocab, tgt_vocab, n_mels, d_model, num_layers, heads, d_fc):
    dh = d_model // heads
    q_scale = 1.0 / math.sqrt(dh)
    keys = iter(jax.random.split(key, 4096))

    def dense(din, dout, col_scale=None):
        w = jax.random.normal(next(keys), (din, dout), jnp.float32) * 0.02
        b = jnp.zeros((dout,), jnp.float32)
        if col_scale is not None:
            w = w * col_scale[None, :]
            b = b * col_scale
        return {'w': w.astype(jnp.bfloat16), 'b': b}

    def ln():
        return (jnp.ones((d_model,), jnp.float32), jnp.zeros((d_model,), jnp.float32))

    qkv_scale = jnp.concatenate([jnp.full((d_model,), q_scale, jnp.float32),
                                 jnp.ones((2 * d_model,), jnp.float32)])
    q_only_scale = jnp.full((d_model,), q_scale, jnp.float32)

    def attn_self():
        return {'qkv': dense(d_model, 3 * d_model, qkv_scale),
                'o': dense(d_model, d_model)}

    def attn_cross():
        return {'q': dense(d_model, d_model, q_only_scale),
                'kv': dense(d_model, 2 * d_model),
                'o': dense(d_model, d_model)}

    params = {
        'emb': jax.random.normal(next(keys), (src_vocab, d_model), jnp.float32) * 0.02,
        'enc_layers': [
            {'attn': attn_self(), 'ln1': ln(),
             'ff1': dense(d_model, d_fc), 'ff2': dense(d_fc, d_model), 'ln2': ln()}
            for _ in range(num_layers)],
        'prenet': dense(n_mels, d_model),           # decoder input: n_mels -> d_model
        'dec_layers': [
            {'self_attn': attn_self(), 'ln1': ln(),
             'cross_attn': attn_cross(), 'ln2': ln(),
             'ff1': dense(d_model, d_fc), 'ff2': dense(d_fc, d_model), 'ln3': ln()}
            for _ in range(num_layers)],
        'head': dense(d_model, tgt_vocab + 1),      # fused fc_out (+ gate column)
    }
    return params


# ----------------------------------------------------------------------------
if __name__ == "__main__":
    # Small, TPU-friendly shapes consistent with the module's forward.
    SRC_VOCAB = 20
    TGT_VOCAB = 16
    N_MELS = 16             # decoder input feature dim (== tgt_vocab for TTS)
    D_MODEL = 32
    NUM_LAYERS = 2
    HEADS = 4
    D_FC = 64
    B, S_SRC, T = 2, 8, 8

    key = jax.random.PRNGKey(0)
    kp, ks, km = jax.random.split(key, 3)

    params = init_params(kp, SRC_VOCAB, TGT_VOCAB, N_MELS,
                         D_MODEL, NUM_LAYERS, HEADS, D_FC)

    # src token ids (0 == padding); pad the tail of the second sequence.
    src = jax.random.randint(ks, (B, S_SRC), 1, SRC_VOCAB, dtype=jnp.int32)
    src = src.at[1, 6:].set(0)

    mels_input = jax.random.normal(km, (B, T, N_MELS), jnp.float32)
    mel_lens = jnp.array([T, 5], dtype=jnp.int32)

    fwd = jax.jit(functools.partial(transformer_forward, heads=HEADS))
    mel_logits, gate_logits = fwd(params, src, mels_input, mel_lens)
    jax.block_until_ready((mel_logits, gate_logits))

    assert mel_logits.shape == (B, T, TGT_VOCAB)
    assert gate_logits.shape == (B, T)
    assert bool(jnp.all(jnp.isfinite(mel_logits))) and bool(jnp.all(jnp.isfinite(gate_logits)))
    print("KERNEL_OK")
</pallas_src>

<mosaic_0001>
module attributes {stable_mosaic.version = 11 : i64} {
  func.func @_matmul_kernel(%arg0: i32, %arg1: i32, %arg2: i32, %arg3: memref<16x16xbf16, #tpu.memory_space<vmem>>, %arg4: memref<16x32xbf16, #tpu.memory_space<vmem>>, %arg5: memref<1x32xf32, #tpu.memory_space<vmem>>, %arg6: memref<16x32xbf16, #tpu.memory_space<vmem>>, %arg7: memref<16x32xf32, #tpu.memory_space<vmem>>) attributes {dimension_semantics = [#tpu.dimension_semantics<parallel>, #tpu.dimension_semantics<parallel>, #tpu.dimension_semantics<arbitrary>], iteration_bounds = array<i64: 1, 1, 1>, scalar_prefetch = 0 : i64, scratch_operands = 1 : i64, tpu.core_type = #tpu.core_type<tc>, window_params = [{transform_indices = @transform_0, window_bounds = array<i64: 16, 16>}, {transform_indices = @transform_1, window_bounds = array<i64: 16, 32>}, {transform_indices = @transform_2, window_bounds = array<i64: 1, 32>}, {transform_indices = @transform_3, window_bounds = array<i64: 16, 32>}]} {
    %c0_i32 = arith.constant 0 : i32
    %0 = arith.cmpi eq, %arg2, %c0_i32 : i32
    %1 = arith.extui %0 : i1 to i32
    %c0_i32_0 = arith.constant 0 : i32
    %2 = arith.cmpi ne, %1, %c0_i32_0 : i32
    scf.if %2 {
      %cst_10 = arith.constant 0.000000e+00 : f32
      %12 = vector.broadcast %cst_10 : f32 to vector<16x32xf32>
      %c0_11 = arith.constant 0 : index
      %c0_12 = arith.constant 0 : index
      %13 = vector.load %arg7[%c0_11, %c0_12] : memref<16x32xf32, #tpu.memory_space<vmem>>, vector<16x32xf32>
      tpu.vector_store %arg7[%c0_11, %c0_12], %12 {strides = array<i32>} : memref<16x32xf32, #tpu.memory_space<vmem>>, vector<16x32xf32>,
    } else {
    }
    %c0 = arith.constant 0 : index
    %c0_1 = arith.constant 0 : index
    %3 = vector.load %arg7[%c0, %c0_1] : memref<16x32xf32, #tpu.memory_space<vmem>>, vector<16x32xf32>
    %c0_2 = arith.constant 0 : index
    %c0_3 = arith.constant 0 : index
    %4 = vector.load %arg3[%c0_2, %c0_3] : memref<16x16xbf16, #tpu.memory_space<vmem>>, vector<16x16xbf16>
    %c0_4 = arith.constant 0 : index
    %c0_5 = arith.constant 0 : index
    %5 = vector.load %arg4[%c0_4, %c0_5] : memref<16x32xbf16, #tpu.memory_space<vmem>>, vector<16x32xbf16>
    %cst = arith.constant dense<0.000000e+00> : vector<16x32xf32>
    %6 = tpu.matmul %4, %5, %cst {dimension_numbers = #tpu.dot_dimension_numbers<[1], [0], [0], [1], [0, 0, 1, 1], [], []>} : vector<16x16xbf16>, vector<16x32xbf16>, vector<16x32xf32> -> vector<16x32xf32>
    %7 = arith.addf %3, %6 : vector<16x32xf32>
    %c0_6 = arith.constant 0 : index
    %c0_7 = arith.constant 0 : index
    %8 = vector.load %arg7[%c0_6, %c0_7] : memref<16x32xf32, #tpu.memory_space<vmem>>, vector<16x32xf32>
    tpu.vector_store %arg7[%c0_6, %c0_7], %7 {strides = array<i32>} : memref<16x32xf32, #tpu.memory_space<vmem>>, vector<16x32xf32>,
    %c0_i32_8 = arith.constant 0 : i32
    %9 = arith.cmpi eq, %arg2, %c0_i32_8 : i32
    %10 = arith.extui %9 : i1 to i32
    %c0_i32_9 = arith.constant 0 : i32
    %11 = arith.cmpi ne, %10, %c0_i32_9 : i32
    scf.if %11 {
      %c0_10 = arith.constant 0 : index
      %c0_11 = arith.constant 0 : index
      %12 = vector.load %arg7[%c0_10, %c0_11] : memref<16x32xf32, #tpu.memory_space<vmem>>, vector<16x32xf32>
      %c0_12 = arith.constant 0 : index
      %c0_13 = arith.constant 0 : index
      %13 = vector.load %arg5[%c0_12, %c0_13] : memref<1x32xf32, #tpu.memory_space<vmem>>, vector<1x32xf32>
      %14 = vector.broadcast %13 : vector<1x32xf32> to vector<16x32xf32>
      %15 = arith.addf %12, %14 : vector<16x32xf32>
      %16 = arith.truncf %15 : vector<16x32xf32> to vector<16x32xbf16>
      %c0_14 = arith.constant 0 : index
      %c0_15 = arith.constant 0 : index
      %17 = vector.load %arg6[%c0_14, %c0_15] : memref<16x32xbf16, #tpu.memory_space<vmem>>, vector<16x32xbf16>
      tpu.vector_store %arg6[%c0_14, %c0_15], %16 {strides = array<i32>} : memref<16x32xbf16, #tpu.memory_space<vmem>>, vector<16x32xbf16>,
    } else {
    }
    return
  }
  func.func @transform_0(%arg0: i32, %arg1: i32, %arg2: i32) -> (i32, i32) {
    %c0_i32 = arith.constant 0 : i32
    return %arg0, %arg2 : i32, i32
  }
  func.func @transform_1(%arg0: i32, %arg1: i32, %arg2: i32) -> (i32, i32) {
    %c0_i32 = arith.constant 0 : i32
    return %arg2, %arg1 : i32, i32
  }
  func.func @transform_2(%arg0: i32, %arg1: i32, %arg2: i32) -> (i32, i32) {
    %c0_i32 = arith.constant 0 : i32
    %c0_i32_0 = arith.constant 0 : i32
    return %c0_i32, %arg1 : i32, i32
  }
  func.func @transform_3(%arg0: i32, %arg1: i32, %arg2: i32) -> (i32, i32) {
    %c0_i32 = arith.constant 0 : i32
    return %arg0, %arg1 : i32, i32
  }
}

module attributes {stable_mosaic.version = 11 : i64} {
  func.func @_matmul_kernel(%arg0: i32, %arg1: i32, %arg2: i32, %arg3: memref<16x32xbf16, #tpu.memory_space<vmem>>, %arg4: memref<32x96xbf16, #tpu.memory_space<vmem>>, %arg5: memref<1x96xf32, #tpu.memory_space<vmem>>, %arg6: memref<16x96xbf16, #tpu.memory_space<vmem>>, %arg7: memref<16x96xf32, #tpu.memory_space<vmem>>) attributes {dimension_semantics = [#tpu.dimension_semantics<parallel>, #tpu.dimension_semantics<parallel>, #tpu.dimension_semantics<arbitrary>], iteration_bounds = array<i64: 1, 1, 1>, scalar_prefetch = 0 : i64, scratch_operands = 1 : i64, tpu.core_type = #tpu.core_type<tc>, window_params = [{transform_indices = @transform_0, window_bounds = array<i64: 16, 32>}, {transform_indices = @transform_1, window_bounds = array<i64: 32, 96>}, {transform_indices = @transform_2, window_bounds = array<i64: 1, 96>}, {transform_indices = @transform_3, window_bounds = array<i64: 16, 96>}]} {
    %c0_i32 = arith.constant 0 : i32
    %0 = arith.cmpi eq, %arg2, %c0_i32 : i32
    %1 = arith.extui %0 : i1 to i32
    %c0_i32_0 = arith.constant 0 : i32
    %2 = arith.cmpi ne, %1, %c0_i32_0 : i32
    scf.if %2 {
      %cst_10 = arith.constant 0.000000e+00 : f32
      %12 = vector.broadcast %cst_10 : f32 to vector<16x96xf32>
      %c0_11 = arith.constant 0 : index
      %c0_12 = arith.constant 0 : index
      %13 = vector.load %arg7[%c0_11, %c0_12] : memref<16x96xf32, #tpu.memory_space<vmem>>, vector<16x96xf32>
      tpu.vector_store %arg7[%c0_11, %c0_12], %12 {strides = array<i32>} : memref<16x96xf32, #tpu.memory_space<vmem>>, vector<16x96xf32>,
    } else {
    }
    %c0 = arith.constant 0 : index
    %c0_1 = arith.constant 0 : index
    %3 = vector.load %arg7[%c0, %c0_1] : memref<16x96xf32, #tpu.memory_space<vmem>>, vector<16x96xf32>
    %c0_2 = arith.constant 0 : index
    %c0_3 = arith.constant 0 : index
    %4 = vector.load %arg3[%c0_2, %c0_3] : memref<16x32xbf16, #tpu.memory_space<vmem>>, vector<16x32xbf16>
    %c0_4 = arith.constant 0 : index
    %c0_5 = arith.constant 0 : index
    %5 = vector.load %arg4[%c0_4, %c0_5] : memref<32x96xbf16, #tpu.memory_space<vmem>>, vector<32x96xbf16>
    %cst = arith.constant dense<0.000000e+00> : vector<16x96xf32>
    %6 = tpu.matmul %4, %5, %cst {dimension_numbers = #tpu.dot_dimension_numbers<[1], [0], [0], [1], [0, 0, 1, 1], [], []>} : vector<16x32xbf16>, vector<32x96xbf16>, vector<16x96xf32> -> vector<16x96xf32>
    %7 = arith.addf %3, %6 : vector<16x96xf32>
    %c0_6 = arith.constant 0 : index
    %c0_7 = arith.constant 0 : index
    %8 = vector.load %arg7[%c0_6, %c0_7] : memref<16x96xf32, #tpu.memory_space<vmem>>, vector<16x96xf32>
    tpu.vector_store %arg7[%c0_6, %c0_7], %7 {strides = array<i32>} : memref<16x96xf32, #tpu.memory_space<vmem>>, vector<16x96xf32>,
    %c0_i32_8 = arith.constant 0 : i32
    %9 = arith.cmpi eq, %arg2, %c0_i32_8 : i32
    %10 = arith.extui %9 : i1 to i32
    %c0_i32_9 = arith.constant 0 : i32
    %11 = arith.cmpi ne, %10, %c0_i32_9 : i32
    scf.if %11 {
      %c0_10 = arith.constant 0 : index
      %c0_11 = arith.constant 0 : index
      %12 = vector.load %arg7[%c0_10, %c0_11] : memref<16x96xf32, #tpu.memory_space<vmem>>, vector<16x96xf32>
      %c0_12 = arith.constant 0 : index
      %c0_13 = arith.constant 0 : index
      %13 = vector.load %arg5[%c0_12, %c0_13] : memref<1x96xf32, #tpu.memory_space<vmem>>, vector<1x96xf32>
      %14 = vector.broadcast %13 : vector<1x96xf32> to vector<16x96xf32>
      %15 = arith.addf %12, %14 : vector<16x96xf32>
      %16 = arith.truncf %15 : vector<16x96xf32> to vector<16x96xbf16>
      %c0_14 = arith.constant 0 : index
      %c0_15 = arith.constant 0 : index
      %17 = vector.load %arg6[%c0_14, %c0_15] : memref<16x96xbf16, #tpu.memory_space<vmem>>, vector<16x96xbf16>
      tpu.vector_store %arg6[%c0_14, %c0_15], %16 {strides = array<i32>} : memref<16x96xbf16, #tpu.memory_space<vmem>>, vector<16x96xbf16>,
    } else {
    }
    return
  }
  func.func @transform_0(%arg0: i32, %arg1: i32, %arg2: i32) -> (i32, i32) {
    %c0_i32 = arith.constant 0 : i32
    return %arg0, %arg2 : i32, i32
  }
  func.func @transform_1(%arg0: i32, %arg1: i32, %arg2: i32) -> (i32, i32) {
    %c0_i32 = arith.constant 0 : i32
    return %arg2, %arg1 : i32, i32
  }
  func.func @transform_2(%arg0: i32, %arg1: i32, %arg2: i32) -> (i32, i32) {
    %c0_i32 = arith.constant 0 : i32
    %c0_i32_0 = arith.constant 0 : i32
    return %c0_i32, %arg1 : i32, i32
  }
  func.func @transform_3(%arg0: i32, %arg1: i32, %arg2: i32) -> (i32, i32) {
    %c0_i32 = arith.constant 0 : i32
    return %arg0, %arg1 : i32, i32
  }
}

module attributes {stable_mosaic.version = 11 : i64} {
  func.func @_attn_kernel(%arg0: i32, %arg1: i32, %arg2: memref<1x1x1x8x8xbf16, #tpu.memory_space<vmem>>, %arg3: memref<1x1x1x8x8xbf16, #tpu.memory_space<vmem>>, %arg4: memref<1x1x1x8x8xbf16, #tpu.memory_space<vmem>>, %arg5: memref<1x1x8xf32, #tpu.memory_space<vmem>>, %arg6: memref<1x1x8x8xbf16, #tpu.memory_space<vmem>>) attributes {dimension_semantics = [#tpu.dimension_semantics<parallel>, #tpu.dimension_semantics<parallel>], iteration_bounds = array<i64: 2, 4>, scalar_prefetch = 0 : i64, scratch_operands = 0 : i64, tpu.core_type = #tpu.core_type<tc>, window_params = [{transform_indices = @transform_0, window_bounds = array<i64: 1, 1, 1, 8, 8>}, {transform_indices = @transform_1, window_bounds = array<i64: 1, 1, 1, 8, 8>}, {transform_indices = @transform_2, window_bounds = array<i64: 1, 1, 1, 8, 8>}, {transform_indices = @transform_3, window_bounds = array<i64: 1, 1, 8>}, {transform_indices = @transform_4, window_bounds = array<i64: 1, 1, 8, 8>}]} {
    %c0 = arith.constant 0 : index
    %c0_0 = arith.constant 0 : index
    %c0_1 = arith.constant 0 : index
    %c0_2 = arith.constant 0 : index
    %c0_3 = arith.constant 0 : index
    %0 = vector.load %arg2[%c0, %c0_0, %c0_1, %c0_2, %c0_3] : memref<1x1x1x8x8xbf16, #tpu.memory_space<vmem>>, vector<1x1x1x8x8xbf16>
    %1 = vector.shape_cast %0 : vector<1x1x1x8x8xbf16> to vector<8x8xbf16>
    %c0_4 = arith.constant 0 : index
    %c0_5 = arith.constant 0 : index
    %c0_6 = arith.constant 0 : index
    %c0_7 = arith.constant 0 : index
    %c0_8 = arith.constant 0 : index
    %2 = vector.load %arg3[%c0_4, %c0_5, %c0_6, %c0_7, %c0_8] : memref<1x1x1x8x8xbf16, #tpu.memory_space<vmem>>, vector<1x1x1x8x8xbf16>
    %3 = vector.shape_cast %2 : vector<1x1x1x8x8xbf16> to vector<8x8xbf16>
    %c0_9 = arith.constant 0 : index
    %c0_10 = arith.constant 0 : index
    %c0_11 = arith.constant 0 : index
    %c0_12 = arith.constant 0 : index
    %c0_13 = arith.constant 0 : index
    %4 = vector.load %arg4[%c0_9, %c0_10, %c0_11, %c0_12, %c0_13] : memref<1x1x1x8x8xbf16, #tpu.memory_space<vmem>>, vector<1x1x1x8x8xbf16>
    %5 = vector.shape_cast %4 : vector<1x1x1x8x8xbf16> to vector<8x8xbf16>
    %c0_14 = arith.constant 0 : index
    %c0_15 = arith.constant 0 : index
    %c0_16 = arith.constant 0 : index
    %6 = vector.load %arg5[%c0_14, %c0_15, %c0_16] : memref<1x1x8xf32, #tpu.memory_space<vmem>>, vector<1x1x8xf32>
    %7 = vector.shape_cast %6 : vector<1x1x8xf32> to vector<1x8xf32>
    %cst = arith.constant -1.000000e+09 : f32
    %8 = vector.broadcast %cst : f32 to vector<1x8xf32>
    %9 = arith.mulf %7, %8 : vector<1x8xf32>
    %10 = vector.shape_cast %9 : vector<1x8xf32> to vector<1x8xf32>
    %11 = vector.broadcast %10 : vector<1x8xf32> to vector<8x8xf32>
    %12 = tpu.iota {dimensions = array<i32: 0>} : vector<8x8xi32>
    %13 = tpu.iota {dimensions = array<i32: 1>} : vector<8x8xi32>
    %14 = arith.cmpi sgt, %13, %12 : vector<8x8xi32>
    %cst_17 = arith.constant -1.000000e+09 : f32
    %cst_18 = arith.constant 0.000000e+00 : f32
    %15 = vector.broadcast %cst_17 : f32 to vector<8x8xf32>
    %16 = vector.broadcast %cst_18 : f32 to vector<8x8xf32>
    %17 = arith.select %14, %15, %16 : vector<8x8xi1>, vector<8x8xf32>
    %18 = arith.addf %11, %17 : vector<8x8xf32>
    %cst_19 = arith.constant dense<0.000000e+00> : vector<8x8xf32>
    %19 = tpu.matmul %1, %3, %cst_19 {dimension_numbers = #tpu.dot_dimension_numbers<[1], [1], [0], [0], [0, 0, 1, 0], [], []>} : vector<8x8xbf16>, vector<8x8xbf16>, vector<8x8xf32> -> vector<8x8xf32>
    %20 = arith.addf %19, %18 : vector<8x8xf32>
    %cst_20 = arith.constant dense<0xFF800000> : vector<8xf32>
    %21 = vector.multi_reduction <maximumf>, %20, %cst_20 [1] : vector<8x8xf32> to vector<8xf32>
    %22 = vector.shape_cast %21 : vector<8xf32> to vector<8x1xf32>
    %23 = vector.broadcast %22 : vector<8x1xf32> to vector<8x8xf32>
    %24 = arith.subf %20, %23 : vector<8x8xf32>
    %25 = math.exp %24 : vector<8x8xf32>
    %cst_21 = arith.constant dense<0.000000e+00> : vector<8xf32>
    %26 = vector.multi_reduction <add>, %25, %cst_21 [1] : vector<8x8xf32> to vector<8xf32>
    %27 = vector.shape_cast %26 : vector<8xf32> to vector<8x1xf32>
    %28 = arith.truncf %25 : vector<8x8xf32> to vector<8x8xbf16>
    %cst_22 = arith.constant dense<0.000000e+00> : vector<8x8xf32>
    %29 = tpu.matmul %28, %5, %cst_22 {dimension_numbers = #tpu.dot_dimension_numbers<[1], [0], [0], [1], [0, 0, 1, 1], [], []>} : vector<8x8xbf16>, vector<8x8xbf16>, vector<8x8xf32> -> vector<8x8xf32>
    %30 = tpu.reciprocal %27 {approx = true} : vector<8x1xf32> -> vector<8x1xf32>
    %31 = vector.broadcast %30 : vector<8x1xf32> to vector<8x8xf32>
    %32 = arith.mulf %29, %31 : vector<8x8xf32>
    %33 = arith.truncf %32 : vector<8x8xf32> to vector<8x8xbf16>
    %c0_23 = arith.constant 0 : index
    %c0_24 = arith.constant 0 : index
    %c0_25 = arith.constant 0 : index
    %c0_26 = arith.constant 0 : index
    %34 = vector.load %arg6[%c0_23, %c0_24, %c0_25, %c0_26] : memref<1x1x8x8xbf16, #tpu.memory_space<vmem>>, vector<1x1x8x8xbf16>
    %35 = vector.shape_cast %34 : vector<1x1x8x8xbf16> to vector<8x8xbf16>
    %36 = vector.shape_cast %33 : vector<8x8xbf16> to vector<1x1x8x8xbf16>
    tpu.vector_store %arg6[%c0_23, %c0_24, %c0_25, %c0_26], %36 {strides = array<i32>} : memref<1x1x8x8xbf16, #tpu.memory_space<vmem>>, vector<1x1x8x8xbf16>,
    return
  }
  func.func @transform_0(%arg0: i32, %arg1: i32) -> (i32, i32, i32, i32, i32) {
    %c0_i32 = arith.constant 0 : i32
    %c0_i32_0 = arith.constant 0 : i32
    %c0_i32_1 = arith.constant 0 : i32
    %c0_i32_2 = arith.constant 0 : i32
    return %c0_i32, %arg0, %arg1, %c0_i32_0, %c0_i32_1 : i32, i32, i32, i32, i32
  }
  func.func @transform_1(%arg0: i32, %arg1: i32) -> (i32, i32, i32, i32, i32) {
    %c1_i32 = arith.constant 1 : i32
    %c0_i32 = arith.constant 0 : i32
    %c0_i32_0 = arith.constant 0 : i32
    %c0_i32_1 = arith.constant 0 : i32
    return %c1_i32, %arg0, %arg1, %c0_i32, %c0_i32_0 : i32, i32, i32, i32, i32
  }
  func.func @transform_2(%arg0: i32, %arg1: i32) -> (i32, i32, i32, i32, i32) {
    %c2_i32 = arith.constant 2 : i32
    %c0_i32 = arith.constant 0 : i32
    %c0_i32_0 = arith.constant 0 : i32
    %c0_i32_1 = arith.constant 0 : i32
    return %c2_i32, %arg0, %arg1, %c0_i32, %c0_i32_0 : i32, i32, i32, i32, i32
  }
  func.func @transform_3(%arg0: i32, %arg1: i32) -> (i32, i32, i32) {
    %c0_i32 = arith.constant 0 : i32
    %c0_i32_0 = arith.constant 0 : i32
    %c0_i32_1 = arith.constant 0 : i32
    return %arg0, %c0_i32, %c0_i32_0 : i32, i32, i32
  }
  func.func @transform_4(%arg0: i32, %arg1: i32) -> (i32, i32, i32, i32) {
    %c0_i32 = arith.constant 0 : i32
    %c0_i32_0 = arith.constant 0 : i32
    %c0_i32_1 = arith.constant 0 : i32
    return %arg0, %arg1, %c0_i32, %c0_i32_0 : i32, i32, i32, i32
  }
}

module attributes {stable_mosaic.version = 11 : i64} {
  func.func @_matmul_add_ln_kernel(%arg0: i32, %arg1: i32, %arg2: memref<16x32xbf16, #tpu.memory_space<vmem>>, %arg3: memref<32x32xbf16, #tpu.memory_space<vmem>>, %arg4: memref<1x32xf32, #tpu.memory_space<vmem>>, %arg5: memref<16x32xbf16, #tpu.memory_space<vmem>>, %arg6: memref<1x32xf32, #tpu.memory_space<vmem>>, %arg7: memref<1x32xf32, #tpu.memory_space<vmem>>, %arg8: memref<16x32xbf16, #tpu.memory_space<vmem>>, %arg9: memref<16x32xf32, #tpu.memory_space<vmem>>) attributes {dimension_semantics = [#tpu.dimension_semantics<parallel>, #tpu.dimension_semantics<arbitrary>], iteration_bounds = array<i64: 1, 1>, scalar_prefetch = 0 : i64, scratch_operands = 1 : i64, tpu.core_type = #tpu.core_type<tc>, window_params = [{transform_indices = @transform_0, window_bounds = array<i64: 16, 32>}, {transform_indices = @transform_1, window_bounds = array<i64: 32, 32>}, {pipeline_mode = #tpu.pipeline_mode<synchronous>, transform_indices = @transform_2, window_bounds = array<i64: 1, 32>}, {transform_indices = @transform_3, window_bounds = array<i64: 16, 32>}, {pipeline_mode = #tpu.pipeline_mode<synchronous>, transform_indices = @transform_4, window_bounds = array<i64: 1, 32>}, {pipeline_mode = #tpu.pipeline_mode<synchronous>, transform_indices = @transform_5, window_bounds = array<i64: 1, 32>}, {transform_indices = @transform_6, window_bounds = array<i64: 16, 32>}]} {
    %c0_i32 = arith.constant 0 : i32
    %0 = arith.cmpi eq, %arg1, %c0_i32 : i32
    %1 = arith.extui %0 : i1 to i32
    %c0_i32_0 = arith.constant 0 : i32
    %2 = arith.cmpi ne, %1, %c0_i32_0 : i32
    scf.if %2 {
      %cst_10 = arith.constant 0.000000e+00 : f32
      %12 = vector.broadcast %cst_10 : f32 to vector<16x32xf32>
      %c0_11 = arith.constant 0 : index
      %c0_12 = arith.constant 0 : index
      %13 = vector.load %arg9[%c0_11, %c0_12] : memref<16x32xf32, #tpu.memory_space<vmem>>, vector<16x32xf32>
      tpu.vector_store %arg9[%c0_11, %c0_12], %12 {strides = array<i32>} : memref<16x32xf32, #tpu.memory_space<vmem>>, vector<16x32xf32>,
    } else {
    }
    %c0 = arith.constant 0 : index
    %c0_1 = arith.constant 0 : index
    %3 = vector.load %arg9[%c0, %c0_1] : memref<16x32xf32, #tpu.memory_space<vmem>>, vector<16x32xf32>
    %c0_2 = arith.constant 0 : index
    %c0_3 = arith.constant 0 : index
    %4 = vector.load %arg2[%c0_2, %c0_3] : memref<16x32xbf16, #tpu.memory_space<vmem>>, vector<16x32xbf16>
    %c0_4 = arith.constant 0 : index
    %c0_5 = arith.constant 0 : index
    %5 = vector.load %arg3[%c0_4, %c0_5] : memref<32x32xbf16, #tpu.memory_space<vmem>>, vector<32x32xbf16>
    %cst = arith.constant dense<0.000000e+00> : vector<16x32xf32>
    %6 = tpu.matmul %4, %5, %cst {dimension_numbers = #tpu.dot_dimension_numbers<[1], [0], [0], [1], [0, 0, 1, 1], [], []>} : vector<16x32xbf16>, vector<32x32xbf16>, vector<16x32xf32> -> vector<16x32xf32>
    %7 = arith.addf %3, %6 : vector<16x32xf32>
    %c0_6 = arith.constant 0 : index
    %c0_7 = arith.constant 0 : index
    %8 = vector.load %arg9[%c0_6, %c0_7] : memref<16x32xf32, #tpu.memory_space<vmem>>, vector<16x32xf32>
    tpu.vector_store %arg9[%c0_6, %c0_7], %7 {strides = array<i32>} : memref<16x32xf32, #tpu.memory_space<vmem>>, vector<16x32xf32>,
    %c0_i32_8 = arith.constant 0 : i32
    %9 = arith.cmpi eq, %arg1, %c0_i32_8 : i32
    %10 = arith.extui %9 : i1 to i32
    %c0_i32_9 = arith.constant 0 : i32
    %11 = arith.cmpi ne, %10, %c0_i32_9 : i32
    scf.if %11 {
      %c0_10 = arith.constant 0 : index
      %c0_11 = arith.constant 0 : index
      %12 = vector.load %arg9[%c0_10, %c0_11] : memref<16x32xf32, #tpu.memory_space<vmem>>, vector<16x32xf32>
      %c0_12 = arith.constant 0 : index
      %c0_13 = arith.constant 0 : index
      %13 = vector.load %arg4[%c0_12, %c0_13] : memref<1x32xf32, #tpu.memory_space<vmem>>, vector<1x32xf32>
      %14 = vector.broadcast %13 : vector<1x32xf32> to vector<16x32xf32>
      %15 = arith.addf %12, %14 : vector<16x32xf32>
      %c0_14 = arith.constant 0 : index
      %c0_15 = arith.constant 0 : index
      %16 = vector.load %arg5[%c0_14, %c0_15] : memref<16x32xbf16, #tpu.memory_space<vmem>>, vector<16x32xbf16>
      %17 = arith.extf %16 : vector<16x32xbf16> to vector<16x32xf32>
      %18 = arith.addf %15, %17 : vector<16x32xf32>
      %cst_16 = arith.constant dense<0.000000e+00> : vector<16xf32>
      %19 = vector.multi_reduction <add>, %18, %cst_16 [1] : vector<16x32xf32> to vector<16xf32>
      %20 = vector.shape_cast %19 : vector<16xf32> to vector<16x1xf32>
      %cst_17 = arith.constant 3.200000e+01 : f32
      %21 = vector.broadcast %cst_17 : f32 to vector<16x1xf32>
      %22 = arith.divf %20, %21 : vector<16x1xf32>
      %23 = vector.broadcast %22 : vector<16x1xf32> to vector<16x32xf32>
      %24 = arith.subf %18, %23 : vector<16x32xf32>
      %25 = arith.mulf %24, %24 : vector<16x32xf32>
      %cst_18 = arith.constant dense<0.000000e+00> : vector<16xf32>
      %26 = vector.multi_reduction <add>, %25, %cst_18 [1] : vector<16x32xf32> to vector<16xf32>
      %27 = vector.shape_cast %26 : vector<16xf32> to vector<16x1xf32>
      %cst_19 = arith.constant 3.200000e+01 : f32
      %28 = vector.broadcast %cst_19 : f32 to vector<16x1xf32>
      %29 = arith.divf %27, %28 : vector<16x1xf32>
      %30 = vector.broadcast %22 : vector<16x1xf32> to vector<16x32xf32>
      %31 = arith.subf %18, %30 : vector<16x32xf32>
      %cst_20 = arith.constant 9.99999974E-6 : f32
      %32 = vector.broadcast %cst_20 : f32 to vector<16x1xf32>
      %33 = arith.addf %29, %32 : vector<16x1xf32>
      %34 = math.rsqrt %33 : vector<16x1xf32>
      %35 = vector.broadcast %34 : vector<16x1xf32> to vector<16x32xf32>
      %36 = arith.mulf %31, %35 : vector<16x32xf32>
      %c0_21 = arith.constant 0 : index
      %c0_22 = arith.constant 0 : index
      %37 = vector.load %arg6[%c0_21, %c0_22] : memref<1x32xf32, #tpu.memory_space<vmem>>, vector<1x32xf32>
      %38 = vector.broadcast %37 : vector<1x32xf32> to vector<16x32xf32>
      %39 = arith.mulf %36, %38 : vector<16x32xf32>
      %c0_23 = arith.constant 0 : index
      %c0_24 = arith.constant 0 : index
      %40 = vector.load %arg7[%c0_23, %c0_24] : memref<1x32xf32, #tpu.memory_space<vmem>>, vector<1x32xf32>
      %41 = vector.broadcast %40 : vector<1x32xf32> to vector<16x32xf32>
      %42 = arith.addf %39, %41 : vector<16x32xf32>
      %43 = arith.truncf %42 : vector<16x32xf32> to vector<16x32xbf16>
      %c0_25 = arith.constant 0 : index
      %c0_26 = arith.constant 0 : index
      %44 = vector.load %arg8[%c0_25, %c0_26] : memref<16x32xbf16, #tpu.memory_space<vmem>>, vector<16x32xbf16>
      tpu.vector_store %arg8[%c0_25, %c0_26], %43 {strides = array<i32>} : memref<16x32xbf16, #tpu.memory_space<vmem>>, vector<16x32xbf16>,
    } else {
    }
    return
  }
  func.func @transform_0(%arg0: i32, %arg1: i32) -> (i32, i32) {
    %c0_i32 = arith.constant 0 : i32
    return %arg0, %arg1 : i32, i32
  }
  func.func @transform_1(%arg0: i32, %arg1: i32) -> (i32, i32) {
    %c0_i32 = arith.constant 0 : i32
    %c0_i32_0 = arith.constant 0 : i32
    return %arg1, %c0_i32 : i32, i32
  }
  func.func @transform_2(%arg0: i32, %arg1: i32) -> (i32, i32) {
    %c0_i32 = arith.constant 0 : i32
    %c0_i32_0 = arith.constant 0 : i32
    %c0_i32_1 = arith.constant 0 : i32
    return %c0_i32, %c0_i32_0 : i32, i32
  }
  func.func @transform_3(%arg0: i32, %arg1: i32) -> (i32, i32) {
    %c0_i32 = arith.constant 0 : i32
    %c0_i32_0 = arith.constant 0 : i32
    return %arg0, %c0_i32 : i32, i32
  }
  func.func @transform_4(%arg0: i32, %arg1: i32) -> (i32, i32) {
    %c0_i32 = arith.constant 0 : i32
    %c0_i32_0 = arith.constant 0 : i32
    %c0_i32_1 = arith.constant 0 : i32
    return %c0_i32, %c0_i32_0 : i32, i32
  }
  func.func @transform_5(%arg0: i32, %arg1: i32) -> (i32, i32) {
    %c0_i32 = arith.constant 0 : i32
    %c0_i32_0 = arith.constant 0 : i32
    %c0_i32_1 = arith.constant 0 : i32
    return %c0_i32, %c0_i32_0 : i32, i32
  }
  func.func @transform_6(%arg0: i32, %arg1: i32) -> (i32, i32) {
    %c0_i32 = arith.constant 0 : i32
    %c0_i32_0 = arith.constant 0 : i32
    return %arg0, %c0_i32 : i32, i32
  }
}

module attributes {stable_mosaic.version = 11 : i64} {
  func.func @_matmul_kernel(%arg0: i32, %arg1: i32, %arg2: i32, %arg3: memref<16x32xbf16, #tpu.memory_space<vmem>>, %arg4: memref<32x32xbf16, #tpu.memory_space<vmem>>, %arg5: memref<1x32xf32, #tpu.memory_space<vmem>>, %arg6: memref<16x32xbf16, #tpu.memory_space<vmem>>, %arg7: memref<16x32xf32, #tpu.memory_space<vmem>>) attributes {dimension_semantics = [#tpu.dimension_semantics<parallel>, #tpu.dimension_semantics<parallel>, #tpu.dimension_semantics<arbitrary>], iteration_bounds = array<i64: 1, 1, 1>, scalar_prefetch = 0 : i64, scratch_operands = 1 : i64, tpu.core_type = #tpu.core_type<tc>, window_params = [{transform_indices = @transform_0, window_bounds = array<i64: 16, 32>}, {transform_indices = @transform_1, window_bounds = array<i64: 32, 32>}, {transform_indices = @transform_2, window_bounds = array<i64: 1, 32>}, {transform_indices = @transform_3, window_bounds = array<i64: 16, 32>}]} {
    %c0_i32 = arith.constant 0 : i32
    %0 = arith.cmpi eq, %arg2, %c0_i32 : i32
    %1 = arith.extui %0 : i1 to i32
    %c0_i32_0 = arith.constant 0 : i32
    %2 = arith.cmpi ne, %1, %c0_i32_0 : i32
    scf.if %2 {
      %cst_10 = arith.constant 0.000000e+00 : f32
      %12 = vector.broadcast %cst_10 : f32 to vector<16x32xf32>
      %c0_11 = arith.constant 0 : index
      %c0_12 = arith.constant 0 : index
      %13 = vector.load %arg7[%c0_11, %c0_12] : memref<16x32xf32, #tpu.memory_space<vmem>>, vector<16x32xf32>
      tpu.vector_store %arg7[%c0_11, %c0_12], %12 {strides = array<i32>} : memref<16x32xf32, #tpu.memory_space<vmem>>, vector<16x32xf32>,
    } else {
    }
    %c0 = arith.constant 0 : index
    %c0_1 = arith.constant 0 : index
    %3 = vector.load %arg7[%c0, %c0_1] : memref<16x32xf32, #tpu.memory_space<vmem>>, vector<16x32xf32>
    %c0_2 = arith.constant 0 : index
    %c0_3 = arith.constant 0 : index
    %4 = vector.load %arg3[%c0_2, %c0_3] : memref<16x32xbf16, #tpu.memory_space<vmem>>, vector<16x32xbf16>
    %c0_4 = arith.constant 0 : index
    %c0_5 = arith.constant 0 : index
    %5 = vector.load %arg4[%c0_4, %c0_5] : memref<32x32xbf16, #tpu.memory_space<vmem>>, vector<32x32xbf16>
    %cst = arith.constant dense<0.000000e+00> : vector<16x32xf32>
    %6 = tpu.matmul %4, %5, %cst {dimension_numbers = #tpu.dot_dimension_numbers<[1], [0], [0], [1], [0, 0, 1, 1], [], []>} : vector<16x32xbf16>, vector<32x32xbf16>, vector<16x32xf32> -> vector<16x32xf32>
    %7 = arith.addf %3, %6 : vector<16x32xf32>
    %c0_6 = arith.constant 0 : index
    %c0_7 = arith.constant 0 : index
    %8 = vector.load %arg7[%c0_6, %c0_7] : memref<16x32xf32, #tpu.memory_space<vmem>>, vector<16x32xf32>
    tpu.vector_store %arg7[%c0_6, %c0_7], %7 {strides = array<i32>} : memref<16x32xf32, #tpu.memory_space<vmem>>, vector<16x32xf32>,
    %c0_i32_8 = arith.constant 0 : i32
    %9 = arith.cmpi eq, %arg2, %c0_i32_8 : i32
    %10 = arith.extui %9 : i1 to i32
    %c0_i32_9 = arith.constant 0 : i32
    %11 = arith.cmpi ne, %10, %c0_i32_9 : i32
    scf.if %11 {
      %c0_10 = arith.constant 0 : index
      %c0_11 = arith.constant 0 : index
      %12 = vector.load %arg7[%c0_10, %c0_11] : memref<16x32xf32, #tpu.memory_space<vmem>>, vector<16x32xf32>
      %c0_12 = arith.constant 0 : index
      %c0_13 = arith.constant 0 : index
      %13 = vector.load %arg5[%c0_12, %c0_13] : memref<1x32xf32, #tpu.memory_space<vmem>>, vector<1x32xf32>
      %14 = vector.broadcast %13 : vector<1x32xf32> to vector<16x32xf32>
      %15 = arith.addf %12, %14 : vector<16x32xf32>
      %16 = arith.truncf %15 : vector<16x32xf32> to vector<16x32xbf16>
      %c0_14 = arith.constant 0 : index
      %c0_15 = arith.constant 0 : index
      %17 = vector.load %arg6[%c0_14, %c0_15] : memref<16x32xbf16, #tpu.memory_space<vmem>>, vector<16x32xbf16>
      tpu.vector_store %arg6[%c0_14, %c0_15], %16 {strides = array<i32>} : memref<16x32xbf16, #tpu.memory_space<vmem>>, vector<16x32xbf16>,
    } else {
    }
    return
  }
  func.func @transform_0(%arg0: i32, %arg1: i32, %arg2: i32) -> (i32, i32) {
    %c0_i32 = arith.constant 0 : i32
    return %arg0, %arg2 : i32, i32
  }
  func.func @transform_1(%arg0: i32, %arg1: i32, %arg2: i32) -> (i32, i32) {
    %c0_i32 = arith.constant 0 : i32
    return %arg2, %arg1 : i32, i32
  }
  func.func @transform_2(%arg0: i32, %arg1: i32, %arg2: i32) -> (i32, i32) {
    %c0_i32 = arith.constant 0 : i32
    %c0_i32_0 = arith.constant 0 : i32
    return %c0_i32, %arg1 : i32, i32
  }
  func.func @transform_3(%arg0: i32, %arg1: i32, %arg2: i32) -> (i32, i32) {
    %c0_i32 = arith.constant 0 : i32
    return %arg0, %arg1 : i32, i32
  }
}

module attributes {stable_mosaic.version = 11 : i64} {
  func.func @_attn_kernel(%arg0: i32, %arg1: i32, %arg2: memref<1x1x1x8x8xbf16, #tpu.memory_space<vmem>>, %arg3: memref<1x1x1x8x8xbf16, #tpu.memory_space<vmem>>, %arg4: memref<1x1x1x8x8xbf16, #tpu.memory_space<vmem>>, %arg5: memref<1x1x8xf32, #tpu.memory_space<vmem>>, %arg6: memref<1x1x8x8xbf16, #tpu.memory_space<vmem>>) attributes {dimension_semantics = [#tpu.dimension_semantics<parallel>, #tpu.dimension_semantics<parallel>], iteration_bounds = array<i64: 2, 4>, scalar_prefetch = 0 : i64, scratch_operands = 0 : i64, tpu.core_type = #tpu.core_type<tc>, window_params = [{transform_indices = @transform_0, window_bounds = array<i64: 1, 1, 1, 8, 8>}, {transform_indices = @transform_1, window_bounds = array<i64: 1, 1, 1, 8, 8>}, {transform_indices = @transform_2, window_bounds = array<i64: 1, 1, 1, 8, 8>}, {transform_indices = @transform_3, window_bounds = array<i64: 1, 1, 8>}, {transform_indices = @transform_4, window_bounds = array<i64: 1, 1, 8, 8>}]} {
    %c0 = arith.constant 0 : index
    %c0_0 = arith.constant 0 : index
    %c0_1 = arith.constant 0 : index
    %c0_2 = arith.constant 0 : index
    %c0_3 = arith.constant 0 : index
    %0 = vector.load %arg2[%c0, %c0_0, %c0_1, %c0_2, %c0_3] : memref<1x1x1x8x8xbf16, #tpu.memory_space<vmem>>, vector<1x1x1x8x8xbf16>
    %1 = vector.shape_cast %0 : vector<1x1x1x8x8xbf16> to vector<8x8xbf16>
    %c0_4 = arith.constant 0 : index
    %c0_5 = arith.constant 0 : index
    %c0_6 = arith.constant 0 : index
    %c0_7 = arith.constant 0 : index
    %c0_8 = arith.constant 0 : index
    %2 = vector.load %arg3[%c0_4, %c0_5, %c0_6, %c0_7, %c0_8] : memref<1x1x1x8x8xbf16, #tpu.memory_space<vmem>>, vector<1x1x1x8x8xbf16>
    %3 = vector.shape_cast %2 : vector<1x1x1x8x8xbf16> to vector<8x8xbf16>
    %c0_9 = arith.constant 0 : index
    %c0_10 = arith.constant 0 : index
    %c0_11 = arith.constant 0 : index
    %c0_12 = arith.constant 0 : index
    %c0_13 = arith.constant 0 : index
    %4 = vector.load %arg4[%c0_9, %c0_10, %c0_11, %c0_12, %c0_13] : memref<1x1x1x8x8xbf16, #tpu.memory_space<vmem>>, vector<1x1x1x8x8xbf16>
    %5 = vector.shape_cast %4 : vector<1x1x1x8x8xbf16> to vector<8x8xbf16>
    %c0_14 = arith.constant 0 : index
    %c0_15 = arith.constant 0 : index
    %c0_16 = arith.constant 0 : index
    %6 = vector.load %arg5[%c0_14, %c0_15, %c0_16] : memref<1x1x8xf32, #tpu.memory_space<vmem>>, vector<1x1x8xf32>
    %7 = vector.shape_cast %6 : vector<1x1x8xf32> to vector<1x8xf32>
    %cst = arith.constant -1.000000e+09 : f32
    %8 = vector.broadcast %cst : f32 to vector<1x8xf32>
    %9 = arith.mulf %7, %8 : vector<1x8xf32>
    %10 = vector.shape_cast %9 : vector<1x8xf32> to vector<1x8xf32>
    %11 = vector.broadcast %10 : vector<1x8xf32> to vector<8x8xf32>
    %cst_17 = arith.constant dense<0.000000e+00> : vector<8x8xf32>
    %12 = tpu.matmul %1, %3, %cst_17 {dimension_numbers = #tpu.dot_dimension_numbers<[1], [1], [0], [0], [0, 0, 1, 0], [], []>} : vector<8x8xbf16>, vector<8x8xbf16>, vector<8x8xf32> -> vector<8x8xf32>
    %13 = arith.addf %12, %11 : vector<8x8xf32>
    %cst_18 = arith.constant dense<0xFF800000> : vector<8xf32>
    %14 = vector.multi_reduction <maximumf>, %13, %cst_18 [1] : vector<8x8xf32> to vector<8xf32>
    %15 = vector.shape_cast %14 : vector<8xf32> to vector<8x1xf32>
    %16 = vector.broadcast %15 : vector<8x1xf32> to vector<8x8xf32>
    %17 = arith.subf %13, %16 : vector<8x8xf32>
    %18 = math.exp %17 : vector<8x8xf32>
    %cst_19 = arith.constant dense<0.000000e+00> : vector<8xf32>
    %19 = vector.multi_reduction <add>, %18, %cst_19 [1] : vector<8x8xf32> to vector<8xf32>
    %20 = vector.shape_cast %19 : vector<8xf32> to vector<8x1xf32>
    %21 = arith.truncf %18 : vector<8x8xf32> to vector<8x8xbf16>
    %cst_20 = arith.constant dense<0.000000e+00> : vector<8x8xf32>
    %22 = tpu.matmul %21, %5, %cst_20 {dimension_numbers = #tpu.dot_dimension_numbers<[1], [0], [0], [1], [0, 0, 1, 1], [], []>} : vector<8x8xbf16>, vector<8x8xbf16>, vector<8x8xf32> -> vector<8x8xf32>
    %23 = tpu.reciprocal %20 {approx = true} : vector<8x1xf32> -> vector<8x1xf32>
    %24 = vector.broadcast %23 : vector<8x1xf32> to vector<8x8xf32>
    %25 = arith.mulf %22, %24 : vector<8x8xf32>
    %26 = arith.truncf %25 : vector<8x8xf32> to vector<8x8xbf16>
    %c0_21 = arith.constant 0 : index
    %c0_22 = arith.constant 0 : index
    %c0_23 = arith.constant 0 : index
    %c0_24 = arith.constant 0 : index
    %27 = vector.load %arg6[%c0_21, %c0_22, %c0_23, %c0_24] : memref<1x1x8x8xbf16, #tpu.memory_space<vmem>>, vector<1x1x8x8xbf16>
    %28 = vector.shape_cast %27 : vector<1x1x8x8xbf16> to vector<8x8xbf16>
    %29 = vector.shape_cast %26 : vector<8x8xbf16> to vector<1x1x8x8xbf16>
    tpu.vector_store %arg6[%c0_21, %c0_22, %c0_23, %c0_24], %29 {strides = array<i32>} : memref<1x1x8x8xbf16, #tpu.memory_space<vmem>>, vector<1x1x8x8xbf16>,
    return
  }
  func.func @transform_0(%arg0: i32, %arg1: i32) -> (i32, i32, i32, i32, i32) {
    %c0_i32 = arith.constant 0 : i32
    %c0_i32_0 = arith.constant 0 : i32
    %c0_i32_1 = arith.constant 0 : i32
    %c0_i32_2 = arith.constant 0 : i32
    return %c0_i32, %arg0, %arg1, %c0_i32_0, %c0_i32_1 : i32, i32, i32, i32, i32
  }
  func.func @transform_1(%arg0: i32, %arg1: i32) -> (i32, i32, i32, i32, i32) {
    %c1_i32 = arith.constant 1 : i32
    %c0_i32 = arith.constant 0 : i32
    %c0_i32_0 = arith.constant 0 : i32
    %c0_i32_1 = arith.constant 0 : i32
    return %c1_i32, %arg0, %arg1, %c0_i32, %c0_i32_0 : i32, i32, i32, i32, i32
  }
  func.func @transform_2(%arg0: i32, %arg1: i32) -> (i32, i32, i32, i32, i32) {
    %c2_i32 = arith.constant 2 : i32
    %c0_i32 = arith.constant 0 : i32
    %c0_i32_0 = arith.constant 0 : i32
    %c0_i32_1 = arith.constant 0 : i32
    return %c2_i32, %arg0, %arg1, %c0_i32, %c0_i32_0 : i32, i32, i32, i32, i32
  }
  func.func @transform_3(%arg0: i32, %arg1: i32) -> (i32, i32, i32) {
    %c0_i32 = arith.constant 0 : i32
    %c0_i32_0 = arith.constant 0 : i32
    %c0_i32_1 = arith.constant 0 : i32
    return %arg0, %c0_i32, %c0_i32_0 : i32, i32, i32
  }
  func.func @transform_4(%arg0: i32, %arg1: i32) -> (i32, i32, i32, i32) {
    %c0_i32 = arith.constant 0 : i32
    %c0_i32_0 = arith.constant 0 : i32
    %c0_i32_1 = arith.constant 0 : i32
    return %arg0, %arg1, %c0_i32, %c0_i32_0 : i32, i32, i32, i32
  }
}

module attributes {stable_mosaic.version = 11 : i64} {
  func.func @_matmul_kernel(%arg0: i32, %arg1: i32, %arg2: i32, %arg3: memref<16x32xbf16, #tpu.memory_space<vmem>>, %arg4: memref<32x64xbf16, #tpu.memory_space<vmem>>, %arg5: memref<1x64xf32, #tpu.memory_space<vmem>>, %arg6: memref<16x64xbf16, #tpu.memory_space<vmem>>, %arg7: memref<16x64xf32, #tpu.memory_space<vmem>>) attributes {dimension_semantics = [#tpu.dimension_semantics<parallel>, #tpu.dimension_semantics<parallel>, #tpu.dimension_semantics<arbitrary>], iteration_bounds = array<i64: 1, 1, 1>, scalar_prefetch = 0 : i64, scratch_operands = 1 : i64, tpu.core_type = #tpu.core_type<tc>, window_params = [{transform_indices = @transform_0, window_bounds = array<i64: 16, 32>}, {transform_indices = @transform_1, window_bounds = array<i64: 32, 64>}, {transform_indices = @transform_2, window_bounds = array<i64: 1, 64>}, {transform_indices = @transform_3, window_bounds = array<i64: 16, 64>}]} {
    %c0_i32 = arith.constant 0 : i32
    %0 = arith.cmpi eq, %arg2, %c0_i32 : i32
    %1 = arith.extui %0 : i1 to i32
    %c0_i32_0 = arith.constant 0 : i32
    %2 = arith.cmpi ne, %1, %c0_i32_0 : i32
    scf.if %2 {
      %cst_10 = arith.constant 0.000000e+00 : f32
      %12 = vector.broadcast %cst_10 : f32 to vector<16x64xf32>
      %c0_11 = arith.constant 0 : index
      %c0_12 = arith.constant 0 : index
      %13 = vector.load %arg7[%c0_11, %c0_12] : memref<16x64xf32, #tpu.memory_space<vmem>>, vector<16x64xf32>
      tpu.vector_store %arg7[%c0_11, %c0_12], %12 {strides = array<i32>} : memref<16x64xf32, #tpu.memory_space<vmem>>, vector<16x64xf32>,
    } else {
    }
    %c0 = arith.constant 0 : index
    %c0_1 = arith.constant 0 : index
    %3 = vector.load %arg7[%c0, %c0_1] : memref<16x64xf32, #tpu.memory_space<vmem>>, vector<16x64xf32>
    %c0_2 = arith.constant 0 : index
    %c0_3 = arith.constant 0 : index
    %4 = vector.load %arg3[%c0_2, %c0_3] : memref<16x32xbf16, #tpu.memory_space<vmem>>, vector<16x32xbf16>
    %c0_4 = arith.constant 0 : index
    %c0_5 = arith.constant 0 : index
    %5 = vector.load %arg4[%c0_4, %c0_5] : memref<32x64xbf16, #tpu.memory_space<vmem>>, vector<32x64xbf16>
    %cst = arith.constant dense<0.000000e+00> : vector<16x64xf32>
    %6 = tpu.matmul %4, %5, %cst {dimension_numbers = #tpu.dot_dimension_numbers<[1], [0], [0], [1], [0, 0, 1, 1], [], []>} : vector<16x32xbf16>, vector<32x64xbf16>, vector<16x64xf32> -> vector<16x64xf32>
    %7 = arith.addf %3, %6 : vector<16x64xf32>
    %c0_6 = arith.constant 0 : index
    %c0_7 = arith.constant 0 : index
    %8 = vector.load %arg7[%c0_6, %c0_7] : memref<16x64xf32, #tpu.memory_space<vmem>>, vector<16x64xf32>
    tpu.vector_store %arg7[%c0_6, %c0_7], %7 {strides = array<i32>} : memref<16x64xf32, #tpu.memory_space<vmem>>, vector<16x64xf32>,
    %c0_i32_8 = arith.constant 0 : i32
    %9 = arith.cmpi eq, %arg2, %c0_i32_8 : i32
    %10 = arith.extui %9 : i1 to i32
    %c0_i32_9 = arith.constant 0 : i32
    %11 = arith.cmpi ne, %10, %c0_i32_9 : i32
    scf.if %11 {
      %c0_10 = arith.constant 0 : index
      %c0_11 = arith.constant 0 : index
      %12 = vector.load %arg7[%c0_10, %c0_11] : memref<16x64xf32, #tpu.memory_space<vmem>>, vector<16x64xf32>
      %c0_12 = arith.constant 0 : index
      %c0_13 = arith.constant 0 : index
      %13 = vector.load %arg5[%c0_12, %c0_13] : memref<1x64xf32, #tpu.memory_space<vmem>>, vector<1x64xf32>
      %14 = vector.broadcast %13 : vector<1x64xf32> to vector<16x64xf32>
      %15 = arith.addf %12, %14 : vector<16x64xf32>
      %16 = arith.truncf %15 : vector<16x64xf32> to vector<16x64xbf16>
      %c0_14 = arith.constant 0 : index
      %c0_15 = arith.constant 0 : index
      %17 = vector.load %arg6[%c0_14, %c0_15] : memref<16x64xbf16, #tpu.memory_space<vmem>>, vector<16x64xbf16>
      tpu.vector_store %arg6[%c0_14, %c0_15], %16 {strides = array<i32>} : memref<16x64xbf16, #tpu.memory_space<vmem>>, vector<16x64xbf16>,
    } else {
    }
    return
  }
  func.func @transform_0(%arg0: i32, %arg1: i32, %arg2: i32) -> (i32, i32) {
    %c0_i32 = arith.constant 0 : i32
    return %arg0, %arg2 : i32, i32
  }
  func.func @transform_1(%arg0: i32, %arg1: i32, %arg2: i32) -> (i32, i32) {
    %c0_i32 = arith.constant 0 : i32
    return %arg2, %arg1 : i32, i32
  }
  func.func @transform_2(%arg0: i32, %arg1: i32, %arg2: i32) -> (i32, i32) {
    %c0_i32 = arith.constant 0 : i32
    %c0_i32_0 = arith.constant 0 : i32
    return %c0_i32, %arg1 : i32, i32
  }
  func.func @transform_3(%arg0: i32, %arg1: i32, %arg2: i32) -> (i32, i32) {
    %c0_i32 = arith.constant 0 : i32
    return %arg0, %arg1 : i32, i32
  }
}

module attributes {stable_mosaic.version = 11 : i64} {
  func.func @_ffn_add_ln_kernel(%arg0: i32, %arg1: memref<16x32xbf16, #tpu.memory_space<vmem>>, %arg2: memref<32x64xbf16, #tpu.memory_space<vmem>>, %arg3: memref<1x64xf32, #tpu.memory_space<vmem>>, %arg4: memref<64x32xbf16, #tpu.memory_space<vmem>>, %arg5: memref<1x32xf32, #tpu.memory_space<vmem>>, %arg6: memref<1x32xf32, #tpu.memory_space<vmem>>, %arg7: memref<1x32xf32, #tpu.memory_space<vmem>>, %arg8: memref<16x32xbf16, #tpu.memory_space<vmem>>) attributes {dimension_semantics = [#tpu.dimension_semantics<parallel>], iteration_bounds = array<i64: 1>, scalar_prefetch = 0 : i64, scratch_operands = 0 : i64, tpu.core_type = #tpu.core_type<tc>, window_params = [{transform_indices = @transform_0, window_bounds = array<i64: 16, 32>}, {pipeline_mode = #tpu.pipeline_mode<synchronous>, transform_indices = @transform_1, window_bounds = array<i64: 32, 64>}, {pipeline_mode = #tpu.pipeline_mode<synchronous>, transform_indices = @transform_2, window_bounds = array<i64: 1, 64>}, {pipeline_mode = #tpu.pipeline_mode<synchronous>, transform_indices = @transform_3, window_bounds = array<i64: 64, 32>}, {pipeline_mode = #tpu.pipeline_mode<synchronous>, transform_indices = @transform_4, window_bounds = array<i64: 1, 32>}, {pipeline_mode = #tpu.pipeline_mode<synchronous>, transform_indices = @transform_5, window_bounds = array<i64: 1, 32>}, {pipeline_mode = #tpu.pipeline_mode<synchronous>, transform_indices = @transform_6, window_bounds = array<i64: 1, 32>}, {transform_indices = @transform_7, window_bounds = array<i64: 16, 32>}]} {
    %c0 = arith.constant 0 : index
    %c0_0 = arith.constant 0 : index
    %0 = vector.load %arg1[%c0, %c0_0] : memref<16x32xbf16, #tpu.memory_space<vmem>>, vector<16x32xbf16>
    %c0_1 = arith.constant 0 : index
    %c0_2 = arith.constant 0 : index
    %1 = vector.load %arg2[%c0_1, %c0_2] : memref<32x64xbf16, #tpu.memory_space<vmem>>, vector<32x64xbf16>
    %cst = arith.constant dense<0.000000e+00> : vector<16x64xf32>
    %2 = tpu.matmul %0, %1, %cst {dimension_numbers = #tpu.dot_dimension_numbers<[1], [0], [0], [1], [0, 0, 1, 1], [], []>} : vector<16x32xbf16>, vector<32x64xbf16>, vector<16x64xf32> -> vector<16x64xf32>
    %c0_3 = arith.constant 0 : index
    %c0_4 = arith.constant 0 : index
    %3 = vector.load %arg3[%c0_3, %c0_4] : memref<1x64xf32, #tpu.memory_space<vmem>>, vector<1x64xf32>
    %4 = vector.broadcast %3 : vector<1x64xf32> to vector<16x64xf32>
    %5 = arith.addf %2, %4 : vector<16x64xf32>
    %cst_5 = arith.constant 0.000000e+00 : f32
    %6 = vector.broadcast %cst_5 : f32 to vector<16x64xf32>
    %7 = arith.maximumf %5, %6 : vector<16x64xf32>
    %8 = arith.truncf %7 : vector<16x64xf32> to vector<16x64xbf16>
    %c0_6 = arith.constant 0 : index
    %c0_7 = arith.constant 0 : index
    %9 = vector.load %arg4[%c0_6, %c0_7] : memref<64x32xbf16, #tpu.memory_space<vmem>>, vector<64x32xbf16>
    %cst_8 = arith.constant dense<0.000000e+00> : vector<16x32xf32>
    %10 = tpu.matmul %8, %9, %cst_8 {dimension_numbers = #tpu.dot_dimension_numbers<[1], [0], [0], [1], [0, 0, 1, 1], [], []>} : vector<16x64xbf16>, vector<64x32xbf16>, vector<16x32xf32> -> vector<16x32xf32>
    %c0_9 = arith.constant 0 : index
    %c0_10 = arith.constant 0 : index
    %11 = vector.load %arg5[%c0_9, %c0_10] : memref<1x32xf32, #tpu.memory_space<vmem>>, vector<1x32xf32>
    %12 = vector.broadcast %11 : vector<1x32xf32> to vector<16x32xf32>
    %13 = arith.addf %10, %12 : vector<16x32xf32>
    %14 = arith.extf %0 : vector<16x32xbf16> to vector<16x32xf32>
    %15 = arith.addf %13, %14 : vector<16x32xf32>
    %cst_11 = arith.constant dense<0.000000e+00> : vector<16xf32>
    %16 = vector.multi_reduction <add>, %15, %cst_11 [1] : vector<16x32xf32> to vector<16xf32>
    %17 = vector.shape_cast %16 : vector<16xf32> to vector<16x1xf32>
    %cst_12 = arith.constant 3.200000e+01 : f32
    %18 = vector.broadcast %cst_12 : f32 to vector<16x1xf32>
    %19 = arith.divf %17, %18 : vector<16x1xf32>
    %20 = vector.broadcast %19 : vector<16x1xf32> to vector<16x32xf32>
    %21 = arith.subf %15, %20 : vector<16x32xf32>
    %22 = arith.mulf %21, %21 : vector<16x32xf32>
    %cst_13 = arith.constant dense<0.000000e+00> : vector<16xf32>
    %23 = vector.multi_reduction <add>, %22, %cst_13 [1] : vector<16x32xf32> to vector<16xf32>
    %24 = vector.shape_cast %23 : vector<16xf32> to vector<16x1xf32>
    %cst_14 = arith.constant 3.200000e+01 : f32
    %25 = vector.broadcast %cst_14 : f32 to vector<16x1xf32>
    %26 = arith.divf %24, %25 : vector<16x1xf32>
    %27 = vector.broadcast %19 : vector<16x1xf32> to vector<16x32xf32>
    %28 = arith.subf %15, %27 : vector<16x32xf32>
    %cst_15 = arith.constant 9.99999974E-6 : f32
    %29 = vector.broadcast %cst_15 : f32 to vector<16x1xf32>
    %30 = arith.addf %26, %29 : vector<16x1xf32>
    %31 = math.rsqrt %30 : vector<16x1xf32>
    %32 = vector.broadcast %31 : vector<16x1xf32> to vector<16x32xf32>
    %33 = arith.mulf %28, %32 : vector<16x32xf32>
    %c0_16 = arith.constant 0 : index
    %c0_17 = arith.constant 0 : index
    %34 = vector.load %arg6[%c0_16, %c0_17] : memref<1x32xf32, #tpu.memory_space<vmem>>, vector<1x32xf32>
    %35 = vector.broadcast %34 : vector<1x32xf32> to vector<16x32xf32>
    %36 = arith.mulf %33, %35 : vector<16x32xf32>
    %c0_18 = arith.constant 0 : index
    %c0_19 = arith.constant 0 : index
    %37 = vector.load %arg7[%c0_18, %c0_19] : memref<1x32xf32, #tpu.memory_space<vmem>>, vector<1x32xf32>
    %38 = vector.broadcast %37 : vector<1x32xf32> to vector<16x32xf32>
    %39 = arith.addf %36, %38 : vector<16x32xf32>
    %40 = arith.truncf %39 : vector<16x32xf32> to vector<16x32xbf16>
    %c0_20 = arith.constant 0 : index
    %c0_21 = arith.constant 0 : index
    %41 = vector.load %arg8[%c0_20, %c0_21] : memref<16x32xbf16, #tpu.memory_space<vmem>>, vector<16x32xbf16>
    tpu.vector_store %arg8[%c0_20, %c0_21], %40 {strides = array<i32>} : memref<16x32xbf16, #tpu.memory_space<vmem>>, vector<16x32xbf16>,
    return
  }
  func.func @transform_0(%arg0: i32) -> (i32, i32) {
    %c0_i32 = arith.constant 0 : i32
    %c0_i32_0 = arith.constant 0 : i32
    return %arg0, %c0_i32 : i32, i32
  }
  func.func @transform_1(%arg0: i32) -> (i32, i32) {
    %c0_i32 = arith.constant 0 : i32
    %c0_i32_0 = arith.constant 0 : i32
    %c0_i32_1 = arith.constant 0 : i32
    return %c0_i32, %c0_i32_0 : i32, i32
  }
  func.func @transform_2(%arg0: i32) -> (i32, i32) {
    %c0_i32 = arith.constant 0 : i32
    %c0_i32_0 = arith.constant 0 : i32
    %c0_i32_1 = arith.constant 0 : i32
    return %c0_i32, %c0_i32_0 : i32, i32
  }
  func.func @transform_3(%arg0: i32) -> (i32, i32) {
    %c0_i32 = arith.constant 0 : i32
    %c0_i32_0 = arith.constant 0 : i32
    %c0_i32_1 = arith.constant 0 : i32
    return %c0_i32, %c0_i32_0 : i32, i32
  }
  func.func @transform_4(%arg0: i32) -> (i32, i32) {
    %c0_i32 = arith.constant 0 : i32
    %c0_i32_0 = arith.constant 0 : i32
    %c0_i32_1 = arith.constant 0 : i32
    return %c0_i32, %c0_i32_0 : i32, i32
  }
  func.func @transform_5(%arg0: i32) -> (i32, i32) {
    %c0_i32 = arith.constant 0 : i32
    %c0_i32_0 = arith.constant 0 : i32
    %c0_i32_1 = arith.constant 0 : i32
    return %c0_i32, %c0_i32_0 : i32, i32
  }
  func.func @transform_6(%arg0: i32) -> (i32, i32) {
    %c0_i32 = arith.constant 0 : i32
    %c0_i32_0 = arith.constant 0 : i32
    %c0_i32_1 = arith.constant 0 : i32
    return %c0_i32, %c0_i32_0 : i32, i32
  }
  func.func @transform_7(%arg0: i32) -> (i32, i32) {
    %c0_i32 = arith.constant 0 : i32
    %c0_i32_0 = arith.constant 0 : i32
    return %arg0, %c0_i32 : i32, i32
  }
}

module attributes {stable_mosaic.version = 11 : i64} {
  func.func @_attn_kernel(%arg0: i32, %arg1: i32, %arg2: memref<1x1x1x8x8xbf16, #tpu.memory_space<vmem>>, %arg3: memref<1x1x1x8x8xbf16, #tpu.memory_space<vmem>>, %arg4: memref<1x1x1x8x8xbf16, #tpu.memory_space<vmem>>, %arg5: memref<1x1x8xf32, #tpu.memory_space<vmem>>, %arg6: memref<1x1x8x8xbf16, #tpu.memory_space<vmem>>) attributes {dimension_semantics = [#tpu.dimension_semantics<parallel>, #tpu.dimension_semantics<parallel>], iteration_bounds = array<i64: 2, 4>, scalar_prefetch = 0 : i64, scratch_operands = 0 : i64, tpu.core_type = #tpu.core_type<tc>, window_params = [{transform_indices = @transform_0, window_bounds = array<i64: 1, 1, 1, 8, 8>}, {transform_indices = @transform_1, window_bounds = array<i64: 1, 1, 1, 8, 8>}, {transform_indices = @transform_2, window_bounds = array<i64: 1, 1, 1, 8, 8>}, {transform_indices = @transform_3, window_bounds = array<i64: 1, 1, 8>}, {transform_indices = @transform_4, window_bounds = array<i64: 1, 1, 8, 8>}]} {
    %c0 = arith.constant 0 : index
    %c0_0 = arith.constant 0 : index
    %c0_1 = arith.constant 0 : index
    %c0_2 = arith.constant 0 : index
    %c0_3 = arith.constant 0 : index
    %0 = vector.load %arg2[%c0, %c0_0, %c0_1, %c0_2, %c0_3] : memref<1x1x1x8x8xbf16, #tpu.memory_space<vmem>>, vector<1x1x1x8x8xbf16>
    %1 = vector.shape_cast %0 : vector<1x1x1x8x8xbf16> to vector<8x8xbf16>
    %c0_4 = arith.constant 0 : index
    %c0_5 = arith.constant 0 : index
    %c0_6 = arith.constant 0 : index
    %c0_7 = arith.constant 0 : index
    %c0_8 = arith.constant 0 : index
    %2 = vector.load %arg3[%c0_4, %c0_5, %c0_6, %c0_7, %c0_8] : memref<1x1x1x8x8xbf16, #tpu.memory_space<vmem>>, vector<1x1x1x8x8xbf16>
    %3 = vector.shape_cast %2 : vector<1x1x1x8x8xbf16> to vector<8x8xbf16>
    %c0_9 = arith.constant 0 : index
    %c0_10 = arith.constant 0 : index
    %c0_11 = arith.constant 0 : index
    %c0_12 = arith.constant 0 : index
    %c0_13 = arith.constant 0 : index
    %4 = vector.load %arg4[%c0_9, %c0_10, %c0_11, %c0_12, %c0_13] : memref<1x1x1x8x8xbf16, #tpu.memory_space<vmem>>, vector<1x1x1x8x8xbf16>
    %5 = vector.shape_cast %4 : vector<1x1x1x8x8xbf16> to vector<8x8xbf16>
    %c0_14 = arith.constant 0 : index
    %c0_15 = arith.constant 0 : index
    %c0_16 = arith.constant 0 : index
    %6 = vector.load %arg5[%c0_14, %c0_15, %c0_16] : memref<1x1x8xf32, #tpu.memory_space<vmem>>, vector<1x1x8xf32>
    %7 = vector.shape_cast %6 : vector<1x1x8xf32> to vector<1x8xf32>
    %cst = arith.constant -1.000000e+09 : f32
    %8 = vector.broadcast %cst : f32 to vector<1x8xf32>
    %9 = arith.mulf %7, %8 : vector<1x8xf32>
    %10 = vector.shape_cast %9 : vector<1x8xf32> to vector<1x8xf32>
    %11 = vector.broadcast %10 : vector<1x8xf32> to vector<8x8xf32>
    %cst_17 = arith.constant dense<0.000000e+00> : vector<8x8xf32>
    %12 = tpu.matmul %1, %3, %cst_17 {dimension_numbers = #tpu.dot_dimension_numbers<[1], [1], [0], [0], [0, 0, 1, 0], [], []>} : vector<8x8xbf16>, vector<8x8xbf16>, vector<8x8xf32> -> vector<8x8xf32>
    %13 = arith.addf %12, %11 : vector<8x8xf32>
    %cst_18 = arith.constant dense<0xFF800000> : vector<8xf32>
    %14 = vector.multi_reduction <maximumf>, %13, %cst_18 [1] : vector<8x8xf32> to vector<8xf32>
    %15 = vector.shape_cast %14 : vector<8xf32> to vector<8x1xf32>
    %16 = vector.broadcast %15 : vector<8x1xf32> to vector<8x8xf32>
    %17 = arith.subf %13, %16 : vector<8x8xf32>
    %18 = math.exp %17 : vector<8x8xf32>
    %cst_19 = arith.constant dense<0.000000e+00> : vector<8xf32>
    %19 = vector.multi_reduction <add>, %18, %cst_19 [1] : vector<8x8xf32> to vector<8xf32>
    %20 = vector.shape_cast %19 : vector<8xf32> to vector<8x1xf32>
    %21 = arith.truncf %18 : vector<8x8xf32> to vector<8x8xbf16>
    %cst_20 = arith.constant dense<0.000000e+00> : vector<8x8xf32>
    %22 = tpu.matmul %21, %5, %cst_20 {dimension_numbers = #tpu.dot_dimension_numbers<[1], [0], [0], [1], [0, 0, 1, 1], [], []>} : vector<8x8xbf16>, vector<8x8xbf16>, vector<8x8xf32> -> vector<8x8xf32>
    %23 = tpu.reciprocal %20 {approx = true} : vector<8x1xf32> -> vector<8x1xf32>
    %24 = vector.broadcast %23 : vector<8x1xf32> to vector<8x8xf32>
    %25 = arith.mulf %22, %24 : vector<8x8xf32>
    %26 = arith.truncf %25 : vector<8x8xf32> to vector<8x8xbf16>
    %c0_21 = arith.constant 0 : index
    %c0_22 = arith.constant 0 : index
    %c0_23 = arith.constant 0 : index
    %c0_24 = arith.constant 0 : index
    %27 = vector.load %arg6[%c0_21, %c0_22, %c0_23, %c0_24] : memref<1x1x8x8xbf16, #tpu.memory_space<vmem>>, vector<1x1x8x8xbf16>
    %28 = vector.shape_cast %27 : vector<1x1x8x8xbf16> to vector<8x8xbf16>
    %29 = vector.shape_cast %26 : vector<8x8xbf16> to vector<1x1x8x8xbf16>
    tpu.vector_store %arg6[%c0_21, %c0_22, %c0_23, %c0_24], %29 {strides = array<i32>} : memref<1x1x8x8xbf16, #tpu.memory_space<vmem>>, vector<1x1x8x8xbf16>,
    return
  }
  func.func @transform_0(%arg0: i32, %arg1: i32) -> (i32, i32, i32, i32, i32) {
    %c0_i32 = arith.constant 0 : i32
    %c0_i32_0 = arith.constant 0 : i32
    %c0_i32_1 = arith.constant 0 : i32
    %c0_i32_2 = arith.constant 0 : i32
    return %c0_i32, %arg0, %arg1, %c0_i32_0, %c0_i32_1 : i32, i32, i32, i32, i32
  }
  func.func @transform_1(%arg0: i32, %arg1: i32) -> (i32, i32, i32, i32, i32) {
    %c0_i32 = arith.constant 0 : i32
    %c0_i32_0 = arith.constant 0 : i32
    %c0_i32_1 = arith.constant 0 : i32
    %c0_i32_2 = arith.constant 0 : i32
    return %c0_i32, %arg0, %arg1, %c0_i32_0, %c0_i32_1 : i32, i32, i32, i32, i32
  }
  func.func @transform_2(%arg0: i32, %arg1: i32) -> (i32, i32, i32, i32, i32) {
    %c1_i32 = arith.constant 1 : i32
    %c0_i32 = arith.constant 0 : i32
    %c0_i32_0 = arith.constant 0 : i32
    %c0_i32_1 = arith.constant 0 : i32
    return %c1_i32, %arg0, %arg1, %c0_i32, %c0_i32_0 : i32, i32, i32, i32, i32
  }
  func.func @transform_3(%arg0: i32, %arg1: i32) -> (i32, i32, i32) {
    %c0_i32 = arith.constant 0 : i32
    %c0_i32_0 = arith.constant 0 : i32
    %c0_i32_1 = arith.constant 0 : i32
    return %arg0, %c0_i32, %c0_i32_0 : i32, i32, i32
  }
  func.func @transform_4(%arg0: i32, %arg1: i32) -> (i32, i32, i32, i32) {
    %c0_i32 = arith.constant 0 : i32
    %c0_i32_0 = arith.constant 0 : i32
    %c0_i32_1 = arith.constant 0 : i32
    return %arg0, %arg1, %c0_i32, %c0_i32_0 : i32, i32, i32, i32
  }
}

module attributes {stable_mosaic.version = 11 : i64} {
  func.func @_matmul_kernel(%arg0: i32, %arg1: i32, %arg2: i32, %arg3: memref<16x32xbf16, #tpu.memory_space<vmem>>, %arg4: memref<32x17xbf16, #tpu.memory_space<vmem>>, %arg5: memref<1x17xf32, #tpu.memory_space<vmem>>, %arg6: memref<16x17xf32, #tpu.memory_space<vmem>>, %arg7: memref<16x17xf32, #tpu.memory_space<vmem>>) attributes {dimension_semantics = [#tpu.dimension_semantics<parallel>, #tpu.dimension_semantics<parallel>, #tpu.dimension_semantics<arbitrary>], iteration_bounds = array<i64: 1, 1, 1>, scalar_prefetch = 0 : i64, scratch_operands = 1 : i64, tpu.core_type = #tpu.core_type<tc>, window_params = [{transform_indices = @transform_0, window_bounds = array<i64: 16, 32>}, {transform_indices = @transform_1, window_bounds = array<i64: 32, 17>}, {transform_indices = @transform_2, window_bounds = array<i64: 1, 17>}, {transform_indices = @transform_3, window_bounds = array<i64: 16, 17>}]} {
    %c0_i32 = arith.constant 0 : i32
    %0 = arith.cmpi eq, %arg2, %c0_i32 : i32
    %1 = arith.extui %0 : i1 to i32
    %c0_i32_0 = arith.constant 0 : i32
    %2 = arith.cmpi ne, %1, %c0_i32_0 : i32
    scf.if %2 {
      %cst_10 = arith.constant 0.000000e+00 : f32
      %12 = vector.broadcast %cst_10 : f32 to vector<16x17xf32>
      %c0_11 = arith.constant 0 : index
      %c0_12 = arith.constant 0 : index
      %13 = vector.load %arg7[%c0_11, %c0_12] : memref<16x17xf32, #tpu.memory_space<vmem>>, vector<16x17xf32>
      tpu.vector_store %arg7[%c0_11, %c0_12], %12 {strides = array<i32>} : memref<16x17xf32, #tpu.memory_space<vmem>>, vector<16x17xf32>,
    } else {
    }
    %c0 = arith.constant 0 : index
    %c0_1 = arith.constant 0 : index
    %3 = vector.load %arg7[%c0, %c0_1] : memref<16x17xf32, #tpu.memory_space<vmem>>, vector<16x17xf32>
    %c0_2 = arith.constant 0 : index
    %c0_3 = arith.constant 0 : index
    %4 = vector.load %arg3[%c0_2, %c0_3] : memref<16x32xbf16, #tpu.memory_space<vmem>>, vector<16x32xbf16>
    %c0_4 = arith.constant 0 : index
    %c0_5 = arith.constant 0 : index
    %5 = vector.load %arg4[%c0_4, %c0_5] : memref<32x17xbf16, #tpu.memory_space<vmem>>, vector<32x17xbf16>
    %cst = arith.constant dense<0.000000e+00> : vector<16x17xf32>
    %6 = tpu.matmul %4, %5, %cst {dimension_numbers = #tpu.dot_dimension_numbers<[1], [0], [0], [1], [0, 0, 1, 1], [], []>} : vector<16x32xbf16>, vector<32x17xbf16>, vector<16x17xf32> -> vector<16x17xf32>
    %7 = arith.addf %3, %6 : vector<16x17xf32>
    %c0_6 = arith.constant 0 : index
    %c0_7 = arith.constant 0 : index
    %8 = vector.load %arg7[%c0_6, %c0_7] : memref<16x17xf32, #tpu.memory_space<vmem>>, vector<16x17xf32>
    tpu.vector_store %arg7[%c0_6, %c0_7], %7 {strides = array<i32>} : memref<16x17xf32, #tpu.memory_space<vmem>>, vector<16x17xf32>,
    %c0_i32_8 = arith.constant 0 : i32
    %9 = arith.cmpi eq, %arg2, %c0_i32_8 : i32
    %10 = arith.extui %9 : i1 to i32
    %c0_i32_9 = arith.constant 0 : i32
    %11 = arith.cmpi ne, %10, %c0_i32_9 : i32
    scf.if %11 {
      %c0_10 = arith.constant 0 : index
      %c0_11 = arith.constant 0 : index
      %12 = vector.load %arg7[%c0_10, %c0_11] : memref<16x17xf32, #tpu.memory_space<vmem>>, vector<16x17xf32>
      %c0_12 = arith.constant 0 : index
      %c0_13 = arith.constant 0 : index
      %13 = vector.load %arg5[%c0_12, %c0_13] : memref<1x17xf32, #tpu.memory_space<vmem>>, vector<1x17xf32>
      %14 = vector.broadcast %13 : vector<1x17xf32> to vector<16x17xf32>
      %15 = arith.addf %12, %14 : vector<16x17xf32>
      %c0_14 = arith.constant 0 : index
      %c0_15 = arith.constant 0 : index
      %16 = vector.load %arg6[%c0_14, %c0_15] : memref<16x17xf32, #tpu.memory_space<vmem>>, vector<16x17xf32>
      tpu.vector_store %arg6[%c0_14, %c0_15], %15 {strides = array<i32>} : memref<16x17xf32, #tpu.memory_space<vmem>>, vector<16x17xf32>,
    } else {
    }
    return
  }
  func.func @transform_0(%arg0: i32, %arg1: i32, %arg2: i32) -> (i32, i32) {
    %c0_i32 = arith.constant 0 : i32
    return %arg0, %arg2 : i32, i32
  }
  func.func @transform_1(%arg0: i32, %arg1: i32, %arg2: i32) -> (i32, i32) {
    %c0_i32 = arith.constant 0 : i32
    return %arg2, %arg1 : i32, i32
  }
  func.func @transform_2(%arg0: i32, %arg1: i32, %arg2: i32) -> (i32, i32) {
    %c0_i32 = arith.constant 0 : i32
    %c0_i32_0 = arith.constant 0 : i32
    return %c0_i32, %arg1 : i32, i32
  }
  func.func @transform_3(%arg0: i32, %arg1: i32, %arg2: i32) -> (i32, i32) {
    %c0_i32 = arith.constant 0 : i32
    return %arg0, %arg1 : i32, i32
  }
}

</mosaic_0001>

<bundles_post_ra>
// kernel: transformer_forward.35
= control target key start
LH: loop header
LB: loop body
LE: loop exit
PB: predicated region body
PF: predicated region fallthrough
CT: control target
= control target key end

     0   :  { %vm19_vm0 = vcmask 785408   ;;  %v151_v0 = vmov 0.0   ;;  %vm152_vm1 = vmmov 0   ;;  %vm47_vm2 = vcmask 261120   ;;  %s195_s1 = inlined_call_operand.vmem [shape: bf16[32,96], index: 1, kind: input, shape index: {}]   ;;  %s196_s0 = inlined_call_operand.vmem [shape: bf16[16,32], index: 0, kind: input, shape index: {}]   ;;  %s197_s2 = inlined_call_operand.vmem [shape: f32[1,96], index: 2, kind: input, shape index: {}]   ;;  %s198_s3 = inlined_call_operand.vmem [shape: bf16[16,96], index: 3, kind: output, shape index: {}]  }
   0x1   :  { %138 = vmatprep.subr.bf16.mxu0 %v151_v0  ;;  %v148_v1 = vld [vmem:[%s195_s1 + $0x8] sm:$0xff]   ;;  %142 = vmatprep.mubr.msk.bf16.mxu0 %vm152_vm1, %v151_v0  ;;  %20 = vst.msk [vmem:[#allocation2] sm:$0xff] %vm19_vm0, %v151_v0  ;;  %21 = vst.msk [vmem:[#allocation2 + $0x8] sm:$0xff] %vm19_vm0, %v151_v0  ;;  %v149_v2 = vld [vmem:[%s195_s1] sm:$0xff]   ;;  %vm119_vm3 = vcmask 781312  }
   0x2   :  { %139 = vmatpush3.bf16.msra.mxu0 %v148_v1  ;;  %v150_v3 = vld [vmem:[%s196_s0] sm:$0xff]  }
   0x3   :  { %140 = vmatprep.subr.bf16.mxu0 %v151_v0  ;;  %v130_v12 = vld [vmem:[%s197_s2] ss:$0 sm:$0xff] }
   0x6   :  { %141 = vmatpush3.bf16.msra.mxu0 %v149_v2 }
   0x8   :  { %v22_v4 = vld [vmem:[#allocation2] sm:$0xff]  ;;  %v23_v8 = vld [vmem:[#allocation2 + $0x8] sm:$0xff] }
   0x9   :  { %143 = vmatmul.mubr.msk.bf16.vlgmr.msra.gmra.mxu0 %vm47_vm2, %v150_v3 }
  0xc9   :  { %v85_v5 = vpop.f32.mrf.mxu0 }
  0xca   :  { %v92_v6 = vadd.f32 %v85_v5, %v22_v4 }
  0xcb   :  { %v144_v7 = vpop.f32.mrf.mxu0 }
  0xcc   :  { %95 = vst.msk [vmem:[#allocation2] sm:$0xff] %vm19_vm0, %v92_v6 }
  0xcd   :  { %v88_v9 = vpop.f32.mrf.mxu0 }
  0xce   :  { %v93_v10 = vadd.f32 %v88_v9, %v23_v8 }
  0xcf   :  { %v145_v11 = vpop.f32.mrf.mxu0 }
  0xd0   :  { %96 = vst.msk [vmem:[#allocation2 + $0x8] sm:$0xff] %vm19_vm0, %v93_v10 }
  0xd3   :  { %v100_v13 = vld [vmem:[#allocation2] sm:$0xff] }
  0xd4   :  { %v109_v14 = vadd.f32 %v130_v12, %v100_v13 }
  0xd6   :  { %v133_v15 = vpack.c.bf16 %v109_v14, %v109_v14 }
  0xd7   :  { %v101_v16 = vld [vmem:[#allocation2 + $0x8] sm:$0xff] }
  0xd8   :  { %120 = vst.msk [vmem:[%s198_s3] sm:$0xf] %vm119_vm3, %v133_v15  ;;  %v110_v17 = vadd.f32 %v130_v12, %v101_v16 }
  0xda   :  { %v134_v18 = vpack.c.bf16 %v110_v17, %v110_v17 }
  0xdc   :  { %121 = vst.msk [vmem:[%s198_s3 + $0x4] sm:$0xf] %vm119_vm3, %v134_v18 }

// kernel: transformer_forward.34
= control target key start
LH: loop header
LB: loop body
LE: loop exit
PB: predicated region body
PF: predicated region fallthrough
CT: control target
= control target key end

     0   :  { %vm19_vm0 = vcmask 261120   ;;  %v138_v0 = vmov 0.0   ;;  %vm139_vm1 = vmmov 0   ;;  %vm39_vm2 = vcmask 130048   ;;  %s179_s1 = inlined_call_operand.vmem [shape: bf16[16,32], index: 1, kind: input, shape index: {}]   ;;  %s180_s0 = inlined_call_operand.vmem [shape: bf16[16,16], index: 0, kind: input, shape index: {}]   ;;  %s181_s2 = inlined_call_operand.vmem [shape: f32[1,32], index: 2, kind: input, shape index: {}]   ;;  %s182_s3 = inlined_call_operand.vmem [shape: bf16[16,32], index: 3, kind: output, shape index: {}]  }
   0x1   :  { %20 = vst.msk [vmem:[#allocation2] sm:$0xff] %vm19_vm0, %v138_v0  ;;  %21 = vst.msk [vmem:[#allocation2 + $0x8] sm:$0xff] %vm19_vm0, %v138_v0  ;;  %128 = vmatprep.subr.bf16.mxu0 %v138_v0  ;;  %v136_v1 = vld [vmem:[%s179_s1] sm:$0xff]   ;;  %130 = vmatprep.mubr.msk.bf16.mxu0 %vm139_vm1, %v138_v0  ;;  %vm111_vm3 = vcmask 257024  }
   0x2   :  { %v137_v2 = vld [vmem:[%s180_s0] sm:$0xff]   ;;  %129 = vmatpush3.bf16.msra.mxu0 %v136_v1 }
   0x3   :  { %v121_v11 = vld [vmem:[%s181_s2] ss:$0 sm:$0xff] }
   0x5   :  { %131 = vmatmul.mubr.msk.bf16.vlgmr.msra.gmra.mxu0 %vm39_vm2, %v137_v2 }
   0x8   :  { %v22_v3 = vld [vmem:[#allocation2] sm:$0xff]  ;;  %v23_v7 = vld [vmem:[#allocation2 + $0x8] sm:$0xff] }
  0xc5   :  { %v77_v4 = vpop.f32.mrf.mxu0 }
  0xc6   :  { %v84_v5 = vadd.f32 %v77_v4, %v22_v3 }
  0xc7   :  { %v132_v6 = vpop.f32.mrf.mxu0 }
  0xc8   :  { %87 = vst.msk [vmem:[#allocation2] sm:$0xff] %vm19_vm0, %v84_v5 }
  0xc9   :  { %v80_v8 = vpop.f32.mrf.mxu0 }
  0xca   :  { %v85_v9 = vadd.f32 %v80_v8, %v23_v7 }
  0xcb   :  { %v133_v10 = vpop.f32.mrf.mxu0 }
  0xcc   :  { %88 = vst.msk [vmem:[#allocation2 + $0x8] sm:$0xff] %vm19_vm0, %v85_v9 }
  0xcf   :  { %v92_v12 = vld [vmem:[#allocation2] sm:$0xff] }
  0xd0   :  { %v101_v13 = vadd.f32 %v121_v11, %v92_v12 }
  0xd2   :  { %v124_v14 = vpack.c.bf16 %v101_v13, %v101_v13 }
  0xd3   :  { %v93_v15 = vld [vmem:[#allocation2 + $0x8] sm:$0xff] }
  0xd4   :  { %112 = vst.msk [vmem:[%s182_s3] sm:$0xf] %vm111_vm3, %v124_v14  ;;  %v102_v16 = vadd.f32 %v121_v11, %v93_v15 }
  0xd6   :  { %v125_v17 = vpack.c.bf16 %v102_v16, %v102_v16 }
  0xd8   :  { %113 = vst.msk [vmem:[%s182_s3 + $0x4] sm:$0xf] %vm111_vm3, %v125_v17 }

// kernel: transformer_forward.36
= control target key start
LH: loop header
LB: loop body
LE: loop exit
PB: predicated region body
PF: predicated region fallthrough
CT: control target
= control target key end

     0   :  { %s724_s15 = smov 0   ;;  %s726_s16 = smov 0   ;;  %s795_s0 = inlined_call_operand.vmem [shape: bf16[3,2,4,8,8], index: 0, kind: input, shape index: {}, may-alias: {0,1,2}]   ;;  %s796_s1 = inlined_call_operand.vmem [shape: bf16[3,2,4,8,8], index: 1, kind: input, shape index: {}, may-alias: {0,1,2}]   ;;  %s797_s2 = inlined_call_operand.vmem [shape: bf16[3,2,4,8,8], index: 2, kind: input, shape index: {}, may-alias: {0,1,2}]   ;;  %s798_s3 = inlined_call_operand.vmem [shape: f32[2,1,8], index: 3, kind: input, shape index: {}]   ;;  %s799_s4 = inlined_call_operand.vmem [shape: bf16[2,4,8,8], index: 4, kind: output, shape index: {}]  }
   0x1   :  { %s728_s17 = smov 0   ;;  %s730_s18 = smov 0  }
   0x2   :  { %s732_s19 = smov 0  }
   0x3 LB: > { %s23_s20 = sadd.s32 1, %s687_s17  ;;  %s26_s21 = sadd.s32 1, %s691_s18  ;;  %s695_s19 = sphi %s732_s19, %s14_s19   ;;  %s691_s18 = sphi %s730_s18, %s803_s18   ;;  %s687_s17 = sphi %s728_s17, %s802_s17   ;;  %s683_s16 = sphi %s726_s16, %s801_s16   ;;  %s679_s15 = sphi %s724_s15, %s800_s15  }
   0x4   : > { %p24_p0 = scmp.ge.s32.totalorder %s23_s20, 4  ;;  %p580_p1 = scmp.ge.s32.totalorder %s695_s19, 1 }
   0x5   : > { %p221_p2 = scmp.lt.s32.totalorder %s695_s19, 9 }
   0x6   : > { %s805_s20 = smov (%p24_p0, %s23_s20), 0  ;;  %s807_s21 = smov (!%p24_p0, %s26_s21), %s691_s18 }
   0x7   : > { %p222_p3 = pnand %p580_p1, %p221_p2  ;;  %p28_p4 = scmp.ge.s32.totalorder %s807_s21, 2 }
   0x8   : > { %p274_p5 = scmp.lt.s32.totalorder (!%p222_p3), %s683_s16, 1  ;;  %p276_p6 = scmp.lt.s32.totalorder (!%p222_p3), %s679_s15, 3 }
   0x9   : > { %s809_s21 = smov (%p28_p4, %s807_s21), 0  ;;  %225 = sbr.rel (%p222_p3) target bundleno = 581 (0x245), region = 36 }
   0xe   : > { %v318_v0 = vlaneseq  ;;  %v697_v1 = vmov 0.0   ;;  %vm698_vm0 = vmmov 0   ;;  %s811_s16 = smov (!%p274_p5, %s683_s16), 1  ;;  %s813_s15 = smov (!%p276_p6, %s679_s15), 3  ;;  %vm330_vm2 = vcmask 64512  }
   0xf   : > { %599 = vmatprep.subr.bf16.mxu0 %v697_v1  ;;  %601 = vmatprep.mubr.msk.bf16.mxu0 %vm698_vm0, %v697_v1  ;;  %s581_s22 = sshll.u32 %s811_s16, 2  ;;  %s302_s25 = scalar_lea.vmem %s798_s3, %s811_s16  ;;  %vm390_vm3 = vcmask 1043456   ;;  %vm437_vm4 = vcmask 60416  }
  0x10   : > { %v319_v2 = vshrl.u32 %v318_v0, 7  ;;  %v326_v3 = vand.u32 127, %v318_v0  ;;  %605 = vmatprep.subr.bf16.mxu1 %v697_v1  ;;  %607 = vmatprep.mubr.msk.bf16.mxu1 %vm698_vm0, %v697_v1  ;;  %s279_s26 = sadd.s32 %s581_s22, %s813_s15  ;;  %v315_v5 = vld [vmem:[%s302_s25] sm:$0x1] }
  0x11   : > { %s757_s27 = sshll.u32 %s279_s26, 2  ;;  %v316_v6 = vmul.f32 -1e+09, %v315_v5 }
  0x12   : > { %v320_v4 = vsub.s32 0, %v319_v2  ;;  %vm327_vm1 = vcmp.gt.s32.totalorder %v326_v3, %v319_v2  ;;  %s507_s30 = scalar_lea.vmem %s796_s1, %s757_s27  ;;  %s281_s7 = scalar_lea.vmem %s795_s0, %s757_s27 }
  0x13   : > { %v328_v7 = vsel %vm327_vm1, -1e+09, %v697_v1  ;;  %v589_v8 = vld [vmem:[%s507_s30 + $0x20] sm:$0xf]  ;;  %s512_s10 = scalar_lea.vmem %s797_s2, %s757_s27  ;;  %s310_s13 = scalar_lea.vmem %s799_s4, %s757_s27 }
  0x14   : > { %v321_v9 = vrot.slane %v316_v6, %v320_v4  ;;  %v335_v10 = vsel %vm330_vm2, %v589_v8, 0  ;;  %v312_v12 = vld [vmem:[%s281_s7] sm:$0xf] }
  0x15   : > { %600 = vmatpush3.bf16.xpose.msra.mxu0 %v335_v10  ;;  %v590_v19 = vld [vmem:[%s512_s10 + $0x40] sm:$0xf] }
  0x16   : > { %v329_v11 = vadd.f32 %v328_v7, %v321_v9  ;;  %v392_v20 = vsel %vm390_vm3, %v590_v19, 0 }
  0x17   : > { %606 = vmatpush3.bf16.msra.mxu1 %v392_v20 }
  0x1c   : > { %602 = vmatmul.mubr.msk.bf16.vlgmr.msra.gmra.mxu0 %vm330_vm2, %v312_v12 }
  0xdc   : > { %v371_v13 = vpop.f32.mrf.mxu0 }
  0xdd   : > { %v372_v14 = vadd.f32 %v371_v13, %v329_v11 }
  0xde   : > { %v603_v15 = vpop.f32.mrf.mxu0 }
  0xdf   : > { %v377_v16 = vsel %vm330_vm2, %v372_v14, -inf }
  0xe0   : > { %378 = vmax.xlane.f32.xlu0 %v377_v16  ;;  %v374_v17 = vpop.f32.mrf.mxu0 }
  0xe2   : > { %v604_v18 = vpop.f32.mrf.mxu0 }
 0x169   : > { %v379_v21 = vpop.xlane.xlu0 %378 }
 0x16a   : > { %v380_v22 = vsub.f32 %v372_v14, %v379_v21 }
 0x16c   : > { %v381_v23 = vmul.f32 1.442695, %v380_v22 }
 0x16e   : > { %653 = vpow2.f32 %v381_v23 }
 0x17b   : > { %v654_v24 = vpop.eup %653 }
 0x17c   : > { %v383_v25 = vsel %vm330_vm2, %v654_v24, 0.0  ;;  %v386_v26 = vpack.c.bf16 %v654_v24, %v654_v24 }
 0x17d   : > { %384 = vadd.xlane.f32.xlu0 %v383_v25 }
 0x17e   : > { %608 = vmatmul.mubr.msk.bf16.vlgmr.msra.gmra.mxu1 %vm330_vm2, %v386_v26 }
 0x206   : > { %v385_v27 = vpop.xlane.xlu0 %384 }
 0x207   : > { %655 = vrcp.f32 %v385_v27 }
 0x214   : > { %v656_v28 = vpop.eup %655 }
 0x23e   : > { %v428_v29 = vpop.f32.mrf.mxu1 }
 0x23f   : > { %v435_v30 = vmul.f32 %v656_v28, %v428_v29 }
 0x240   : > { %v609_v31 = vpop.f32.mrf.mxu1 }
 0x241   : > { %v436_v32 = vpack.c.bf16 %v435_v30, %v435_v30 }
 0x242   : > { %v431_v33 = vpop.f32.mrf.mxu1 }
 0x243   : > { %438 = vst.msk [vmem:[%s310_s13] sm:$0xf] %vm437_vm4, %v436_v32 }
 0x244   : > { %v610_v34 = vpop.f32.mrf.mxu1 }
 0x245 PF: > { %s14_s19 = sadd.s32 1, %s695_s19   ;;  %s800_s15 = smov %s687_s17 }
 0x246   : > { %p11_p7 = scmp.ge.s32.totalorder %s14_s19, 10   ;;  %s801_s16 = smov %s691_s18 }
 0x247   : > { %s802_s17 = smov %s805_s20  ;;  %s803_s18 = smov %s809_s21 }
 0x248   :  { %13 = sbr.rel (!%p11_p7) target bundleno = 3 (0x3), region = 75 }

// kernel: transformer_forward.37
= control target key start
LH: loop header
LB: loop body
LE: loop exit
PB: predicated region body
PF: predicated region fallthrough
CT: control target
= control target key end

     0   :  { %vm28_vm0 = vcmask 261120   ;;  %v220_v0 = vmov 0.0   ;;  %vm221_vm1 = vmmov 0   ;;  %vm178_vm2 = vcmask 257024   ;;  %s293_s1 = inlined_call_operand.vmem [shape: bf16[32,32], index: 1, kind: input, shape index: {}]   ;;  %s294_s0 = inlined_call_operand.vmem [shape: bf16[16,32], index: 0, kind: input, shape index: {}]   ;;  %s295_s3 = inlined_call_operand.vmem [shape: bf16[16,32], index: 3, kind: input, shape index: {}]   ;;  %s296_s2 = inlined_call_operand.vmem [shape: f32[1,32], index: 2, kind: input, shape index: {}]   ;;  %s297_s4 = inlined_call_operand.vmem [shape: f32[1,32], index: 4, kind: input, shape index: {}]   ;;  %s298_s5 = inlined_call_operand.vmem [shape: f32[1,32], index: 5, kind: input, shape index: {}]   ;;  %s299_s6 = inlined_call_operand.vmem [shape: bf16[16,32], index: 6, kind: output, shape index: {}]  }
   0x1   :  { %203 = vmatprep.subr.bf16.mxu0 %v220_v0  ;;  %v213_v1 = vld [vmem:[%s293_s1 + $0x8] sm:$0xff]   ;;  %207 = vmatprep.mubr.msk.bf16.mxu0 %vm221_vm1, %v220_v0  ;;  %29 = vst.msk [vmem:[#allocation2] sm:$0xff] %vm28_vm0, %v220_v0  ;;  %30 = vst.msk [vmem:[#allocation2 + $0x8] sm:$0xff] %vm28_vm0, %v220_v0  ;;  %v214_v2 = vld [vmem:[%s293_s1] sm:$0xff]  }
   0x2   :  { %204 = vmatpush3.bf16.msra.mxu0 %v213_v1  ;;  %v215_v3 = vld [vmem:[%s294_s0] sm:$0xff]  }
   0x3   :  { %205 = vmatprep.subr.bf16.mxu0 %v220_v0  ;;  %v197_v12 = vld [vmem:[%s295_s3] sm:$0xff]  }
   0x4   :  { %v189_v13 = vld [vmem:[%s296_s2] ss:$0 sm:$0xff]  ;;  %v198_v14 = vunpack.c.l.bf16 %v197_v12  ;;  %v199_v18 = vunpack.c.h.bf16 %v197_v12 }
   0x5   :  { %v190_v41 = vld [vmem:[%s297_s4] ss:$0 sm:$0xff] }
   0x6   :  { %206 = vmatpush3.bf16.msra.mxu0 %v214_v2  ;;  %v191_v43 = vld [vmem:[%s298_s5] ss:$0 sm:$0xff] }
   0x8   :  { %v31_v4 = vld [vmem:[#allocation2] sm:$0xff]  ;;  %v32_v8 = vld [vmem:[#allocation2 + $0x8] sm:$0xff] }
   0x9   :  { %208 = vmatmul.mubr.msk.bf16.vlgmr.msra.gmra.mxu0 %vm28_vm0, %v215_v3 }
  0xc9   :  { %v94_v5 = vpop.f32.mrf.mxu0 }
  0xca   :  { %v101_v6 = vadd.f32 %v94_v5, %v31_v4 }
  0xcb   :  { %v209_v7 = vpop.f32.mrf.mxu0 }
  0xcc   :  { %103 = vst.msk [vmem:[#allocation2] sm:$0xff] %vm28_vm0, %v101_v6 }
  0xcd   :  { %v97_v9 = vpop.f32.mrf.mxu0 }
  0xce   :  { %v102_v10 = vadd.f32 %v97_v9, %v32_v8 }
  0xcf   :  { %v210_v11 = vpop.f32.mrf.mxu0 }
  0xd0   :  { %104 = vst.msk [vmem:[#allocation2 + $0x8] sm:$0xff] %vm28_vm0, %v102_v10 }
  0xd3   :  { %v108_v15 = vld [vmem:[#allocation2] sm:$0xff] }
  0xd4   :  { %v117_v16 = vadd.f32 %v189_v13, %v108_v15 }
  0xd6   :  { %v123_v17 = vadd.f32 %v198_v14, %v117_v16 }
  0xd7   :  { %v109_v19 = vld [vmem:[#allocation2 + $0x8] sm:$0xff] }
  0xd8   :  { %v125_v20 = vsel %vm28_vm0, %v123_v17, 0.0  ;;  %v118_v21 = vadd.f32 %v189_v13, %v109_v19 }
  0xd9   :  { %126 = vadd.xlane.f32.xlu0 %v125_v20 }
  0xda   :  { %v124_v22 = vadd.f32 %v199_v18, %v118_v21 }
  0xdc   :  { %v128_v23 = vsel %vm28_vm0, %v124_v22, 0.0 }
  0xdd   :  { %129 = vadd.xlane.f32.xlu0 %v128_v23 }
 0x162   :  { %v127_v24 = vpop.xlane.xlu0 %126 }
 0x163   :  { %v132_v25 = vmul.f32 0.03125, %v127_v24 }
 0x165   :  { %v134_v26 = vsub.f32 %v123_v17, %v132_v25 }
 0x166   :  { %v130_v27 = vpop.xlane.xlu0 %129 }
 0x167   :  { %v133_v28 = vmul.f32 0.03125, %v130_v27  ;;  %v136_v29 = vmul.f32 %v134_v26, %v134_v26 }
 0x169   :  { %v135_v30 = vsub.f32 %v124_v22, %v133_v28  ;;  %v138_v31 = vsel %vm28_vm0, %v136_v29, 0.0 }
 0x16a   :  { %139 = vadd.xlane.f32.xlu1 %v138_v31 }
 0x16b   :  { %v137_v32 = vmul.f32 %v135_v30, %v135_v30 }
 0x16d   :  { %v141_v33 = vsel %vm28_vm0, %v137_v32, 0.0 }
 0x16e   :  { %142 = vadd.xlane.f32.xlu1 %v141_v33 }
 0x1f3   :  { %v140_v34 = vpop.xlane.xlu1 %139 }
 0x1f4   :  { %v144_v35 = vmul.f32 0.03125, %v140_v34 }
 0x1f6   :  { %v146_v36 = vadd.f32 1e-05, %v144_v35 }
 0x1f7   :  { %v143_v37 = vpop.xlane.xlu1 %142 }
 0x1f8   :  { %216 = vrsqrt.f32 %v146_v36  ;;  %v145_v38 = vmul.f32 0.03125, %v143_v37 }
 0x1fa   :  { %v147_v39 = vadd.f32 1e-05, %v145_v38 }
 0x1fc   :  { %218 = vrsqrt.f32 %v147_v39 }
 0x205   :  { %v217_v40 = vpop.eup %216 }
 0x206   :  { %v150_v42 = vmul.f32 %v217_v40, %v134_v26 }
 0x208   :  { %v159_v44 = vmul.f32 %v190_v41, %v150_v42 }
 0x209   :  { %v219_v45 = vpop.eup %218 }
 0x20a   :  { %v168_v46 = vadd.f32 %v191_v43, %v159_v44  ;;  %v151_v47 = vmul.f32 %v219_v45, %v135_v30 }
 0x20c   :  { %v194_v48 = vpack.c.bf16 %v168_v46, %v168_v46  ;;  %v160_v49 = vmul.f32 %v190_v41, %v151_v47 }
 0x20e   :  { %179 = vst.msk [vmem:[%s299_s6] sm:$0xf] %vm178_vm2, %v194_v48  ;;  %v169_v50 = vadd.f32 %v191_v43, %v160_v49 }
 0x210   :  { %v195_v51 = vpack.c.bf16 %v169_v50, %v169_v50 }
 0x212   :  { %180 = vst.msk [vmem:[%s299_s6 + $0x4] sm:$0xf] %vm178_vm2, %v195_v51 }

// kernel: transformer_forward.38
= control target key start
LH: loop header
LB: loop body
LE: loop exit
PB: predicated region body
PF: predicated region fallthrough
CT: control target
= control target key end

     0   :  { %vm19_vm0 = vcmask 261120   ;;  %v150_v0 = vmov 0.0   ;;  %vm151_vm1 = vmmov 0   ;;  %vm118_vm2 = vcmask 257024   ;;  %s195_s1 = inlined_call_operand.vmem [shape: bf16[32,32], index: 1, kind: input, shape index: {}]   ;;  %s196_s0 = inlined_call_operand.vmem [shape: bf16[16,32], index: 0, kind: input, shape index: {}]   ;;  %s197_s2 = inlined_call_operand.vmem [shape: f32[1,32], index: 2, kind: input, shape index: {}]   ;;  %s198_s3 = inlined_call_operand.vmem [shape: bf16[16,32], index: 3, kind: output, shape index: {}]  }
   0x1   :  { %137 = vmatprep.subr.bf16.mxu0 %v150_v0  ;;  %v147_v1 = vld [vmem:[%s195_s1 + $0x8] sm:$0xff]   ;;  %141 = vmatprep.mubr.msk.bf16.mxu0 %vm151_vm1, %v150_v0  ;;  %20 = vst.msk [vmem:[#allocation2] sm:$0xff] %vm19_vm0, %v150_v0  ;;  %21 = vst.msk [vmem:[#allocation2 + $0x8] sm:$0xff] %vm19_vm0, %v150_v0  ;;  %v148_v2 = vld [vmem:[%s195_s1] sm:$0xff]  }
   0x2   :  { %138 = vmatpush3.bf16.msra.mxu0 %v147_v1  ;;  %v149_v3 = vld [vmem:[%s196_s0] sm:$0xff]  }
   0x3   :  { %139 = vmatprep.subr.bf16.mxu0 %v150_v0  ;;  %v129_v12 = vld [vmem:[%s197_s2] ss:$0 sm:$0xff] }
   0x6   :  { %140 = vmatpush3.bf16.msra.mxu0 %v148_v2 }
   0x8   :  { %v22_v4 = vld [vmem:[#allocation2] sm:$0xff]  ;;  %v23_v8 = vld [vmem:[#allocation2 + $0x8] sm:$0xff] }
   0x9   :  { %142 = vmatmul.mubr.msk.bf16.vlgmr.msra.gmra.mxu0 %vm19_vm0, %v149_v3 }
  0xc9   :  { %v85_v5 = vpop.f32.mrf.mxu0 }
  0xca   :  { %v92_v6 = vadd.f32 %v85_v5, %v22_v4 }
  0xcb   :  { %v143_v7 = vpop.f32.mrf.mxu0 }
  0xcc   :  { %94 = vst.msk [vmem:[#allocation2] sm:$0xff] %vm19_vm0, %v92_v6 }
  0xcd   :  { %v88_v9 = vpop.f32.mrf.mxu0 }
  0xce   :  { %v93_v10 = vadd.f32 %v88_v9, %v23_v8 }
  0xcf   :  { %v144_v11 = vpop.f32.mrf.mxu0 }
  0xd0   :  { %95 = vst.msk [vmem:[#allocation2 + $0x8] sm:$0xff] %vm19_vm0, %v93_v10 }
  0xd3   :  { %v99_v13 = vld [vmem:[#allocation2] sm:$0xff] }
  0xd4   :  { %v108_v14 = vadd.f32 %v129_v12, %v99_v13 }
  0xd6   :  { %v132_v15 = vpack.c.bf16 %v108_v14, %v108_v14 }
  0xd7   :  { %v100_v16 = vld [vmem:[#allocation2 + $0x8] sm:$0xff] }
  0xd8   :  { %119 = vst.msk [vmem:[%s198_s3] sm:$0xf] %vm118_vm2, %v132_v15  ;;  %v109_v17 = vadd.f32 %v129_v12, %v100_v16 }
  0xda   :  { %v133_v18 = vpack.c.bf16 %v109_v17, %v109_v17 }
  0xdc   :  { %120 = vst.msk [vmem:[%s198_s3 + $0x4] sm:$0xf] %vm118_vm2, %v133_v18 }

// kernel: transformer_forward.27
= control target key start
LH: loop header
LB: loop body
LE: loop exit
PB: predicated region body
PF: predicated region fallthrough
CT: control target
= control target key end

     0   :  { %s717_s15 = smov 0   ;;  %s719_s16 = smov 0   ;;  %s788_s0 = inlined_call_operand.vmem [shape: bf16[3,2,4,8,8], index: 0, kind: input, shape index: {}, may-alias: {0,1,2}]   ;;  %s789_s1 = inlined_call_operand.vmem [shape: bf16[3,2,4,8,8], index: 1, kind: input, shape index: {}, may-alias: {0,1,2}]   ;;  %s790_s2 = inlined_call_operand.vmem [shape: bf16[3,2,4,8,8], index: 2, kind: input, shape index: {}, may-alias: {0,1,2}]   ;;  %s791_s3 = inlined_call_operand.vmem [shape: f32[2,1,8], index: 3, kind: input, shape index: {}]   ;;  %s792_s4 = inlined_call_operand.vmem [shape: bf16[2,4,8,8], index: 4, kind: output, shape index: {}]  }
   0x1   :  { %s721_s17 = smov 0   ;;  %s723_s18 = smov 0  }
   0x2   :  { %s725_s19 = smov 0  }
   0x3 LB: > { %s23_s20 = sadd.s32 1, %s680_s17  ;;  %s26_s21 = sadd.s32 1, %s684_s18  ;;  %s688_s19 = sphi %s725_s19, %s14_s19   ;;  %s684_s18 = sphi %s723_s18, %s796_s18   ;;  %s680_s17 = sphi %s721_s17, %s795_s17   ;;  %s676_s16 = sphi %s719_s16, %s794_s16   ;;  %s672_s15 = sphi %s717_s15, %s793_s15  }
   0x4   : > { %p24_p0 = scmp.ge.s32.totalorder %s23_s20, 4  ;;  %p573_p1 = scmp.ge.s32.totalorder %s688_s19, 1 }
   0x5   : > { %p221_p2 = scmp.lt.s32.totalorder %s688_s19, 9 }
   0x6   : > { %s798_s20 = smov (%p24_p0, %s23_s20), 0  ;;  %s800_s21 = smov (!%p24_p0, %s26_s21), %s684_s18 }
   0x7   : > { %p222_p3 = pnand %p573_p1, %p221_p2  ;;  %p28_p4 = scmp.ge.s32.totalorder %s800_s21, 2 }
   0x8   : > { %p274_p5 = scmp.lt.s32.totalorder (!%p222_p3), %s676_s16, 1  ;;  %p276_p6 = scmp.lt.s32.totalorder (!%p222_p3), %s672_s15, 3 }
   0x9   : > { %s802_s21 = smov (%p28_p4, %s800_s21), 0  ;;  %225 = sbr.rel (%p222_p3) target bundleno = 581 (0x245), region = 36 }
   0xe   : > { %v690_v0 = vmov 0.0   ;;  %vm691_vm0 = vmmov 0   ;;  %s804_s16 = smov (!%p274_p5, %s676_s16), 1  ;;  %s806_s15 = smov (!%p276_p6, %s672_s15), 3  ;;  %vm323_vm1 = vcmask 64512   ;;  %v318_v4 = vlaneseq }
   0xf   : > { %592 = vmatprep.subr.bf16.mxu0 %v690_v0  ;;  %594 = vmatprep.mubr.msk.bf16.mxu0 %vm691_vm0, %v690_v0  ;;  %s574_s22 = sshll.u32 %s804_s16, 2  ;;  %s302_s7 = scalar_lea.vmem %s791_s3, %s804_s16  ;;  %vm383_vm2 = vcmask 1043456   ;;  %vm430_vm3 = vcmask 60416  }
  0x10   : > { %598 = vmatprep.subr.bf16.mxu1 %v690_v0  ;;  %600 = vmatprep.mubr.msk.bf16.mxu1 %vm691_vm0, %v690_v0  ;;  %s279_s23 = sadd.s32 %s574_s22, %s806_s15  ;;  %v319_v5 = vshrl.u32 %v318_v4, 7  ;;  %v315_v6 = vld [vmem:[%s302_s7] sm:$0x1] }
  0x11   : > { %s747_s24 = sshll.u32 %s279_s23, 2  ;;  %v316_v7 = vmul.f32 -1e+09, %v315_v6 }
  0x12   : > { %s500_s27 = scalar_lea.vmem %s789_s1, %s747_s24  ;;  %s281_s30 = scalar_lea.vmem %s788_s0, %s747_s24  ;;  %v320_v8 = vsub.s32 0, %v319_v5 }
  0x13   : > { %v582_v1 = vld [vmem:[%s500_s27 + $0x20] sm:$0xf]  ;;  %s505_s10 = scalar_lea.vmem %s790_s2, %s747_s24  ;;  %s310_s13 = scalar_lea.vmem %s792_s4, %s747_s24 }
  0x14   : > { %v328_v2 = vsel %vm323_vm1, %v582_v1, 0  ;;  %v312_v3 = vld [vmem:[%s281_s30] sm:$0xf]  ;;  %v321_v9 = vrot.slane %v316_v7, %v320_v8 }
  0x15   : > { %593 = vmatpush3.bf16.xpose.msra.mxu0 %v328_v2  ;;  %v583_v16 = vld [vmem:[%s505_s10 + $0x40] sm:$0xf] }
  0x16   : > { %v385_v17 = vsel %vm383_vm2, %v583_v16, 0 }
  0x17   : > { %599 = vmatpush3.bf16.msra.mxu1 %v385_v17 }
  0x1c   : > { %595 = vmatmul.mubr.msk.bf16.vlgmr.msra.gmra.mxu0 %vm323_vm1, %v312_v3 }
  0xdc   : > { %v364_v10 = vpop.f32.mrf.mxu0 }
  0xdd   : > { %v365_v11 = vadd.f32 %v364_v10, %v321_v9 }
  0xde   : > { %v596_v12 = vpop.f32.mrf.mxu0 }
  0xdf   : > { %v370_v13 = vsel %vm323_vm1, %v365_v11, -inf }
  0xe0   : > { %371 = vmax.xlane.f32.xlu0 %v370_v13  ;;  %v367_v14 = vpop.f32.mrf.mxu0 }
  0xe2   : > { %v597_v15 = vpop.f32.mrf.mxu0 }
 0x169   : > { %v372_v18 = vpop.xlane.xlu0 %371 }
 0x16a   : > { %v373_v19 = vsub.f32 %v365_v11, %v372_v18 }
 0x16c   : > { %v374_v20 = vmul.f32 1.442695, %v373_v19 }
 0x16e   : > { %646 = vpow2.f32 %v374_v20 }
 0x17b   : > { %v647_v21 = vpop.eup %646 }
 0x17c   : > { %v376_v22 = vsel %vm323_vm1, %v647_v21, 0.0  ;;  %v379_v23 = vpack.c.bf16 %v647_v21, %v647_v21 }
 0x17d   : > { %377 = vadd.xlane.f32.xlu0 %v376_v22 }
 0x17e   : > { %601 = vmatmul.mubr.msk.bf16.vlgmr.msra.gmra.mxu1 %vm323_vm1, %v379_v23 }
 0x206   : > { %v378_v24 = vpop.xlane.xlu0 %377 }
 0x207   : > { %648 = vrcp.f32 %v378_v24 }
 0x214   : > { %v649_v25 = vpop.eup %648 }
 0x23e   : > { %v421_v26 = vpop.f32.mrf.mxu1 }
 0x23f   : > { %v428_v27 = vmul.f32 %v649_v25, %v421_v26 }
 0x240   : > { %v602_v28 = vpop.f32.mrf.mxu1 }
 0x241   : > { %v429_v29 = vpack.c.bf16 %v428_v27, %v428_v27 }
 0x242   : > { %v424_v30 = vpop.f32.mrf.mxu1 }
 0x243   : > { %431 = vst.msk [vmem:[%s310_s13] sm:$0xf] %vm430_vm3, %v429_v29 }
 0x244   : > { %v603_v31 = vpop.f32.mrf.mxu1 }
 0x245 PF: > { %s14_s19 = sadd.s32 1, %s688_s19   ;;  %s793_s15 = smov %s680_s17 }
 0x246   : > { %p11_p7 = scmp.ge.s32.totalorder %s14_s19, 10   ;;  %s794_s16 = smov %s684_s18 }
 0x247   : > { %s795_s17 = smov %s798_s20  ;;  %s796_s18 = smov %s802_s21 }
 0x248   :  { %13 = sbr.rel (!%p11_p7) target bundleno = 3 (0x3), region = 75 }

// kernel: transformer_forward.39
= control target key start
LH: loop header
LB: loop body
LE: loop exit
PB: predicated region body
PF: predicated region fallthrough
CT: control target
= control target key end

     0   :  { %vm19_vm0 = vcmask 523264   ;;  %v151_v0 = vmov 0.0   ;;  %vm152_vm1 = vmmov 0   ;;  %vm47_vm2 = vcmask 261120   ;;  %s195_s1 = inlined_call_operand.vmem [shape: bf16[32,64], index: 1, kind: input, shape index: {}]   ;;  %s196_s0 = inlined_call_operand.vmem [shape: bf16[16,32], index: 0, kind: input, shape index: {}]   ;;  %s197_s2 = inlined_call_operand.vmem [shape: f32[1,64], index: 2, kind: input, shape index: {}]   ;;  %s198_s3 = inlined_call_operand.vmem [shape: bf16[16,64], index: 3, kind: output, shape index: {}]  }
   0x1   :  { %138 = vmatprep.subr.bf16.mxu0 %v151_v0  ;;  %v148_v1 = vld [vmem:[%s195_s1 + $0x8] sm:$0xff]   ;;  %142 = vmatprep.mubr.msk.bf16.mxu0 %vm152_vm1, %v151_v0  ;;  %20 = vst.msk [vmem:[#allocation2] sm:$0xff] %vm19_vm0, %v151_v0  ;;  %21 = vst.msk [vmem:[#allocation2 + $0x8] sm:$0xff] %vm19_vm0, %v151_v0  ;;  %v149_v2 = vld [vmem:[%s195_s1] sm:$0xff]   ;;  %vm119_vm3 = vcmask 519168  }
   0x2   :  { %139 = vmatpush3.bf16.msra.mxu0 %v148_v1  ;;  %v150_v3 = vld [vmem:[%s196_s0] sm:$0xff]  }
   0x3   :  { %140 = vmatprep.subr.bf16.mxu0 %v151_v0  ;;  %v130_v12 = vld [vmem:[%s197_s2] ss:$0 sm:$0xff] }
   0x6   :  { %141 = vmatpush3.bf16.msra.mxu0 %v149_v2 }
   0x8   :  { %v22_v4 = vld [vmem:[#allocation2] sm:$0xff]  ;;  %v23_v8 = vld [vmem:[#allocation2 + $0x8] sm:$0xff] }
   0x9   :  { %143 = vmatmul.mubr.msk.bf16.vlgmr.msra.gmra.mxu0 %vm47_vm2, %v150_v3 }
  0xc9   :  { %v85_v5 = vpop.f32.mrf.mxu0 }
  0xca   :  { %v92_v6 = vadd.f32 %v85_v5, %v22_v4 }
  0xcb   :  { %v144_v7 = vpop.f32.mrf.mxu0 }
  0xcc   :  { %95 = vst.msk [vmem:[#allocation2] sm:$0xff] %vm19_vm0, %v92_v6 }
  0xcd   :  { %v88_v9 = vpop.f32.mrf.mxu0 }
  0xce   :  { %v93_v10 = vadd.f32 %v88_v9, %v23_v8 }
  0xcf   :  { %v145_v11 = vpop.f32.mrf.mxu0 }
  0xd0   :  { %96 = vst.msk [vmem:[#allocation2 + $0x8] sm:$0xff] %vm19_vm0, %v93_v10 }
  0xd3   :  { %v100_v13 = vld [vmem:[#allocation2] sm:$0xff] }
  0xd4   :  { %v109_v14 = vadd.f32 %v130_v12, %v100_v13 }
  0xd6   :  { %v133_v15 = vpack.c.bf16 %v109_v14, %v109_v14 }
  0xd7   :  { %v101_v16 = vld [vmem:[#allocation2 + $0x8] sm:$0xff] }
  0xd8   :  { %120 = vst.msk [vmem:[%s198_s3] sm:$0xf] %vm119_vm3, %v133_v15  ;;  %v110_v17 = vadd.f32 %v130_v12, %v101_v16 }
  0xda   :  { %v134_v18 = vpack.c.bf16 %v110_v17, %v110_v17 }
  0xdc   :  { %121 = vst.msk [vmem:[%s198_s3 + $0x4] sm:$0xf] %vm119_vm3, %v134_v18 }

// kernel: transformer_forward.29
= control target key start
LH: loop header
LB: loop body
LE: loop exit
PB: predicated region body
PF: predicated region fallthrough
CT: control target
= control target key end

     0   :  { %v312_v0 = vmov 0.0   ;;  %vm313_vm0 = vmmov 0   ;;  %vm57_vm1 = vcmask 261120   ;;  %vm144_vm2 = vcmask 523264   ;;  %s398_s1 = inlined_call_operand.vmem [shape: bf16[32,64], index: 1, kind: input, shape index: {}]   ;;  %s399_s0 = inlined_call_operand.vmem [shape: bf16[16,32], index: 0, kind: input, shape index: {}]   ;;  %s400_s3 = inlined_call_operand.vmem [shape: bf16[64,32], index: 3, kind: input, shape index: {}]   ;;  %s401_s2 = inlined_call_operand.vmem [shape: f32[1,64], index: 2, kind: input, shape index: {}]   ;;  %s402_s4 = inlined_call_operand.vmem [shape: f32[1,32], index: 4, kind: input, shape index: {}]   ;;  %s403_s5 = inlined_call_operand.vmem [shape: f32[1,32], index: 5, kind: input, shape index: {}]   ;;  %s404_s6 = inlined_call_operand.vmem [shape: f32[1,32], index: 6, kind: input, shape index: {}]   ;;  %s405_s7 = inlined_call_operand.vmem [shape: bf16[16,32], index: 7, kind: output, shape index: {}]  }
   0x1   :  { %278 = vmatprep.subr.bf16.mxu0 %v312_v0  ;;  %v300_v1 = vld [vmem:[%s398_s1 + $0x8] sm:$0xff]   ;;  %282 = vmatprep.mubr.msk.bf16.mxu0 %vm313_vm0, %v312_v0  ;;  %v301_v2 = vld [vmem:[%s398_s1] sm:$0xff]   ;;  %v303_v4 = vld [vmem:[%s400_s3 + $0x18] sm:$0xff]   ;;  %vm246_vm3 = vcmask 257024  }
   0x2   :  { %286 = vmatprep.subr.bf16.mxu1 %v312_v0  ;;  %294 = vmatprep.mubr.msk.bf16.mxu1 %vm313_vm0, %v312_v0  ;;  %v27_v3 = vld [vmem:[%s399_s0] sm:$0xff]   ;;  %v304_v5 = vld [vmem:[%s400_s3 + $0x10] sm:$0xff]   ;;  %v305_v6 = vld [vmem:[%s400_s3 + $0x8] sm:$0xff]  }
   0x3   :  { %279 = vmatpush3.bf16.msra.mxu0 %v300_v1  ;;  %287 = vmatpush3.bf16.msra.mxu1 %v303_v4  ;;  %v306_v7 = vld [vmem:[%s400_s3] sm:$0xff]   ;;  %v189_v19 = vunpack.c.l.bf16 %v27_v3  ;;  %v190_v24 = vunpack.c.h.bf16 %v27_v3 }
   0x4   :  { %280 = vmatprep.subr.bf16.mxu0 %v312_v0  ;;  %288 = vmatprep.subr.bf16.mxu1 %v312_v0  ;;  %v253_v8 = vld [vmem:[%s401_s2] ss:$0 sm:$0xff] }
   0x5   :  { %v258_v18 = vld [vmem:[%s402_s4] ss:$0 sm:$0xff] }
   0x6   :  { %v264_v48 = vld [vmem:[%s403_s5] ss:$0 sm:$0xff] }
   0x7   :  { %281 = vmatpush3.bf16.msra.mxu0 %v301_v2  ;;  %289 = vmatpush3.bf16.msra.mxu1 %v304_v5  ;;  %v265_v50 = vld [vmem:[%s404_s6] ss:$0 sm:$0xff] }
   0x8   :  { %290 = vmatprep.subr.bf16.mxu1 %v312_v0 }
   0xa   :  { %283 = vmatmul.mubr.msk.bf16.vlgmr.msra.gmra.mxu0 %vm57_vm1, %v27_v3 }
   0xb   :  { %291 = vmatpush3.bf16.msra.mxu1 %v305_v6 }
   0xc   :  { %292 = vmatprep.subr.bf16.mxu1 %v312_v0 }
   0xf   :  { %293 = vmatpush3.bf16.msra.mxu1 %v306_v7 }
  0xca   :  { %v95_v9 = vpop.f32.mrf.mxu0 }
  0xcb   :  { %v96_v11 = vadd.f32 %v253_v8, %v95_v9 }
  0xcc   :  { %v284_v10 = vpop.f32.mrf.mxu0 }
  0xcd   :  { %v102_v15 = vmax.f32 %v96_v11, 0.0 }
  0xce   :  { %v98_v12 = vpop.f32.mrf.mxu0 }
  0xcf   :  { %v99_v13 = vadd.f32 %v253_v8, %v98_v12 }
  0xd0   :  { %v285_v14 = vpop.f32.mrf.mxu0 }
  0xd1   :  { %v103_v16 = vmax.f32 %v99_v13, 0.0 }
  0xd3   :  { %v104_v17 = vpack.c.bf16 %v103_v16, %v102_v15 }
  0xd5   :  { %295 = vmatmul.mubr.msk.bf16.vlgmr.msra.gmra.mxu1 %vm144_vm2, %v104_v17 }
 0x195   :  { %v182_v20 = vpop.f32.mrf.mxu1 }
 0x196   :  { %v183_v21 = vadd.f32 %v258_v18, %v182_v20 }
 0x197   :  { %v296_v22 = vpop.f32.mrf.mxu1 }
 0x198   :  { %v191_v23 = vadd.f32 %v189_v19, %v183_v21 }
 0x199   :  { %v185_v25 = vpop.f32.mrf.mxu1 }
 0x19a   :  { %v186_v26 = vadd.f32 %v258_v18, %v185_v25  ;;  %v193_v27 = vsel %vm57_vm1, %v191_v23, 0.0 }
 0x19b   :  { %194 = vadd.xlane.f32.xlu0 %v193_v27  ;;  %v297_v28 = vpop.f32.mrf.mxu1 }
 0x19c   :  { %v192_v29 = vadd.f32 %v190_v24, %v186_v26 }
 0x19e   :  { %v196_v30 = vsel %vm57_vm1, %v192_v29, 0.0 }
 0x19f   :  { %197 = vadd.xlane.f32.xlu0 %v196_v30 }
 0x224   :  { %v195_v31 = vpop.xlane.xlu0 %194 }
 0x225   :  { %v200_v32 = vmul.f32 0.03125, %v195_v31 }
 0x227   :  { %v202_v33 = vsub.f32 %v191_v23, %v200_v32 }
 0x228   :  { %v198_v34 = vpop.xlane.xlu0 %197 }
 0x229   :  { %v201_v35 = vmul.f32 0.03125, %v198_v34  ;;  %v204_v36 = vmul.f32 %v202_v33, %v202_v33 }
 0x22b   :  { %v203_v37 = vsub.f32 %v192_v29, %v201_v35  ;;  %v206_v38 = vsel %vm57_vm1, %v204_v36, 0.0 }
 0x22c   :  { %207 = vadd.xlane.f32.xlu1 %v206_v38 }
 0x22d   :  { %v205_v39 = vmul.f32 %v203_v37, %v203_v37 }
 0x22f   :  { %v209_v40 = vsel %vm57_vm1, %v205_v39, 0.0 }
 0x230   :  { %210 = vadd.xlane.f32.xlu1 %v209_v40 }
 0x2b5   :  { %v208_v41 = vpop.xlane.xlu1 %207 }
 0x2b6   :  { %v212_v42 = vmul.f32 0.03125, %v208_v41 }
 0x2b8   :  { %v214_v43 = vadd.f32 1e-05, %v212_v42 }
 0x2b9   :  { %v211_v44 = vpop.xlane.xlu1 %210 }
 0x2ba   :  { %308 = vrsqrt.f32 %v214_v43  ;;  %v213_v45 = vmul.f32 0.03125, %v211_v44 }
 0x2bc   :  { %v215_v46 = vadd.f32 1e-05, %v213_v45 }
 0x2be   :  { %310 = vrsqrt.f32 %v215_v46 }
 0x2c7   :  { %v309_v47 = vpop.eup %308 }
 0x2c8   :  { %v218_v49 = vmul.f32 %v309_v47, %v202_v33 }
 0x2ca   :  { %v227_v51 = vmul.f32 %v264_v48, %v218_v49 }
 0x2cb   :  { %v311_v52 = vpop.eup %310 }
 0x2cc   :  { %v236_v53 = vadd.f32 %v265_v50, %v227_v51  ;;  %v219_v54 = vmul.f32 %v311_v52, %v203_v37 }
 0x2ce   :  { %v268_v55 = vpack.c.bf16 %v236_v53, %v236_v53  ;;  %v228_v56 = vmul.f32 %v264_v48, %v219_v54 }
 0x2d0   :  { %247 = vst.msk [vmem:[%s405_s7] sm:$0xf] %vm246_vm3, %v268_v55  ;;  %v237_v57 = vadd.f32 %v265_v50, %v228_v56 }
 0x2d2   :  { %v269_v58 = vpack.c.bf16 %v237_v57, %v237_v57 }
 0x2d4   :  { %248 = vst.msk [vmem:[%s405_s7 + $0x4] sm:$0xf] %vm246_vm3, %v269_v58 }

// kernel: squeeze.1
= control target key start
LH: loop header
LB: loop body
LE: loop exit
PB: predicated region body
PF: predicated region fallthrough
CT: control target
= control target key end

     0   :  { %s77_s0 = inlined_call_operand.vmem [shape: f32[16], index: 0, kind: input, shape index: {}]   ;;  %s78_s1 = inlined_call_operand.hbm [shape: f32[2,8], index: 1, kind: output, shape index: {}]  }
   0x1   :  { %v6_v0 = vld [vmem:[%s77_s0] sm:$0x1] }
   0x2   :  { %2 = vsyncpa [#allocation1], 0  ;;  %7 = vst [vmem:[#allocation3] sm:$0x1] %v6_v0  ;;  %vm9_vm0 = vcmask 64512   ;;  %s59_s0 = smov 120  }
   0x3   :  { %s60_s8 = smov [#allocation0]  }
   0x4   :  { %s29_s9 = sshll.u32 %s60_s8, 4  ;;  %s30_s9 = int_to_ptr.vmem [resolvable:$true] %s29_s9 }
   0x5   :  { %s37_s10 = scalar_lea.vmem %s30_s9, 32  ;;  %p42_p1 = scmp.lt.s32.totalorder %s30_s9, %s30_s9 }
   0x6   :  { %p38_p0 = scmp.ne.s32.totalorder %s30_s9, %s37_s10  ;;  %p43_p2 = scmp.lt.s32.totalorder %s37_s10, %s37_s10 }
   0x8   :  { %p44_p3 = por %p43_p2, %p42_p1 }
   0x9   :  { %v11_v1 = vld [vmem:[#allocation3] sm:$0x1]  }
   0xa   :  { %v8_v2 = vld [vmem:[#allocation3] sm:$0x1]   ;;  %12 = vrot.lane.b32.xlu0 %v11_v1, %s59_s0  ;;  %p45_p4 = pnand %p44_p3, %p38_p0 }
   0xb   :  { %10 = vst.msk [vmem:[#allocation2] sm:$0x1] %vm9_vm0, %v8_v2  }
  0x7c   :  { %v13_v3 = vpop.permute.xlu0 %12  }
  0x7d   :  { %16 = vst.msk [vmem:[#allocation2 + $0x1] sm:$0x1] %vm9_vm0, %v13_v3  }
  0x84   :  { %v21_v4 = vld [vmem:[#allocation2] sm:$0x3] }
  0x85   :  { %24 = vst [vmem:[#allocation0] sm:$0x3] %v21_v4 }
  0x86   :  { %48 = shalt.err (!%p45_p4)
}
  0x87   :  { %32 = dma.vmem_to_hbm [thread:$0]  %s30_s9, 32, %s78_s1, [#allocation1]  }
  0x88   :  { %57 = dma.done.wait [#allocation1], 32  }
  0x89   :  { %58 = vsyncadd [#allocation1], 4294967264 }
  0x8a   :  { %34 = vsyncpa [#allocation1], 1 }

// kernel: transformer_forward.40
= control target key start
LH: loop header
LB: loop body
LE: loop exit
PB: predicated region body
PF: predicated region fallthrough
CT: control target
= control target key end

     0   :  { %s710_s15 = smov 0   ;;  %s712_s16 = smov 0   ;;  %s781_s0 = inlined_call_operand.vmem [shape: bf16[1,2,4,8,8], index: 0, kind: input, shape index: {}]   ;;  %s782_s1 = inlined_call_operand.vmem [shape: bf16[2,2,4,8,8], index: 1, kind: input, shape index: {}, may-alias: {1,2}]   ;;  %s783_s2 = inlined_call_operand.vmem [shape: bf16[2,2,4,8,8], index: 2, kind: input, shape index: {}, may-alias: {1,2}]   ;;  %s784_s3 = inlined_call_operand.vmem [shape: f32[2,1,8], index: 3, kind: input, shape index: {}]   ;;  %s785_s4 = inlined_call_operand.vmem [shape: bf16[2,4,8,8], index: 4, kind: output, shape index: {}]  }
   0x1   :  { %s714_s17 = smov 0   ;;  %s716_s18 = smov 0  }
   0x2   :  { %s718_s19 = smov 0  }
   0x3 LB: > { %s23_s20 = sadd.s32 1, %s673_s17  ;;  %s26_s21 = sadd.s32 1, %s677_s18  ;;  %s681_s19 = sphi %s718_s19, %s14_s19   ;;  %s677_s18 = sphi %s716_s18, %s789_s18   ;;  %s673_s17 = sphi %s714_s17, %s788_s17   ;;  %s669_s16 = sphi %s712_s16, %s787_s16   ;;  %s665_s15 = sphi %s710_s15, %s786_s15  }
   0x4   : > { %p24_p0 = scmp.ge.s32.totalorder %s23_s20, 4  ;;  %p567_p1 = scmp.ge.s32.totalorder %s681_s19, 1 }
   0x5   : > { %p220_p2 = scmp.lt.s32.totalorder %s681_s19, 9 }
   0x6   : > { %s791_s20 = smov (%p24_p0, %s23_s20), 0  ;;  %s793_s21 = smov (!%p24_p0, %s26_s21), %s677_s18 }
   0x7   : > { %p221_p3 = pnand %p567_p1, %p220_p2  ;;  %p28_p4 = scmp.ge.s32.totalorder %s793_s21, 2 }
   0x8   : > { %p272_p5 = scmp.lt.s32.totalorder (!%p221_p3), %s669_s16, 1  ;;  %p274_p6 = scmp.lt.s32.totalorder (!%p221_p3), %s665_s15, 3 }
   0x9   : > { %s795_s21 = smov (%p28_p4, %s793_s21), 0  ;;  %224 = sbr.rel (%p221_p3) target bundleno = 581 (0x245), region = 36 }
   0xe   : > { %v683_v0 = vmov 0.0   ;;  %vm684_vm0 = vmmov 0   ;;  %s797_s16 = smov (!%p272_p5, %s669_s16), 1  ;;  %s799_s15 = smov (!%p274_p6, %s665_s15), 3  ;;  %vm320_vm1 = vcmask 64512   ;;  %v315_v4 = vlaneseq }
   0xf   : > { %585 = vmatprep.subr.bf16.mxu0 %v683_v0  ;;  %587 = vmatprep.mubr.msk.bf16.mxu0 %vm684_vm0, %v683_v0  ;;  %s568_s22 = sshll.u32 %s797_s16, 2  ;;  %s299_s7 = scalar_lea.vmem %s784_s3, %s797_s16  ;;  %vm380_vm2 = vcmask 1043456   ;;  %vm427_vm3 = vcmask 60416  }
  0x10   : > { %591 = vmatprep.subr.bf16.mxu1 %v683_v0  ;;  %593 = vmatprep.mubr.msk.bf16.mxu1 %vm684_vm0, %v683_v0  ;;  %s277_s23 = sadd.s32 %s568_s22, %s799_s15  ;;  %v316_v5 = vshrl.u32 %v315_v4, 7  ;;  %v312_v6 = vld [vmem:[%s299_s7] sm:$0x1] }
  0x11   : > { %s740_s24 = sshll.u32 %s277_s23, 2  ;;  %v313_v7 = vmul.f32 -1e+09, %v312_v6 }
  0x12   : > { %s287_s27 = scalar_lea.vmem %s782_s1, %s740_s24  ;;  %s279_s30 = scalar_lea.vmem %s781_s0, %s740_s24  ;;  %v317_v8 = vsub.s32 0, %v316_v5 }
  0x13   : > { %v310_v1 = vld [vmem:[%s287_s27] sm:$0xf]  ;;  %s499_s10 = scalar_lea.vmem %s783_s2, %s740_s24  ;;  %s307_s13 = scalar_lea.vmem %s785_s4, %s740_s24 }
  0x14   : > { %v325_v2 = vsel %vm320_vm1, %v310_v1, 0  ;;  %v309_v3 = vld [vmem:[%s279_s30] sm:$0xf]  ;;  %v318_v9 = vrot.slane %v313_v7, %v317_v8 }
  0x15   : > { %586 = vmatpush3.bf16.xpose.msra.mxu0 %v325_v2  ;;  %v576_v16 = vld [vmem:[%s499_s10 + $0x20] sm:$0xf] }
  0x16   : > { %v382_v17 = vsel %vm380_vm2, %v576_v16, 0 }
  0x17   : > { %592 = vmatpush3.bf16.msra.mxu1 %v382_v17 }
  0x1c   : > { %588 = vmatmul.mubr.msk.bf16.vlgmr.msra.gmra.mxu0 %vm320_vm1, %v309_v3 }
  0xdc   : > { %v361_v10 = vpop.f32.mrf.mxu0 }
  0xdd   : > { %v362_v11 = vadd.f32 %v361_v10, %v318_v9 }
  0xde   : > { %v589_v12 = vpop.f32.mrf.mxu0 }
  0xdf   : > { %v367_v13 = vsel %vm320_vm1, %v362_v11, -inf }
  0xe0   : > { %368 = vmax.xlane.f32.xlu0 %v367_v13  ;;  %v364_v14 = vpop.f32.mrf.mxu0 }
  0xe2   : > { %v590_v15 = vpop.f32.mrf.mxu0 }
 0x169   : > { %v369_v18 = vpop.xlane.xlu0 %368 }
 0x16a   : > { %v370_v19 = vsub.f32 %v362_v11, %v369_v18 }
 0x16c   : > { %v371_v20 = vmul.f32 1.442695, %v370_v19 }
 0x16e   : > { %639 = vpow2.f32 %v371_v20 }
 0x17b   : > { %v640_v21 = vpop.eup %639 }
 0x17c   : > { %v373_v22 = vsel %vm320_vm1, %v640_v21, 0.0  ;;  %v376_v23 = vpack.c.bf16 %v640_v21, %v640_v21 }
 0x17d   : > { %374 = vadd.xlane.f32.xlu0 %v373_v22 }
 0x17e   : > { %594 = vmatmul.mubr.msk.bf16.vlgmr.msra.gmra.mxu1 %vm320_vm1, %v376_v23 }
 0x206   : > { %v375_v24 = vpop.xlane.xlu0 %374 }
 0x207   : > { %641 = vrcp.f32 %v375_v24 }
 0x214   : > { %v642_v25 = vpop.eup %641 }
 0x23e   : > { %v418_v26 = vpop.f32.mrf.mxu1 }
 0x23f   : > { %v425_v27 = vmul.f32 %v642_v25, %v418_v26 }
 0x240   : > { %v595_v28 = vpop.f32.mrf.mxu1 }
 0x241   : > { %v426_v29 = vpack.c.bf16 %v425_v27, %v425_v27 }
 0x242   : > { %v421_v30 = vpop.f32.mrf.mxu1 }
 0x243   : > { %428 = vst.msk [vmem:[%s307_s13] sm:$0xf] %vm427_vm3, %v426_v29 }
 0x244   : > { %v596_v31 = vpop.f32.mrf.mxu1 }
 0x245 PF: > { %s14_s19 = sadd.s32 1, %s681_s19   ;;  %s786_s15 = smov %s673_s17 }
 0x246   : > { %p11_p7 = scmp.ge.s32.totalorder %s14_s19, 10   ;;  %s787_s16 = smov %s677_s18 }
 0x247   : > { %s788_s17 = smov %s791_s20  ;;  %s789_s18 = smov %s795_s21 }
 0x248   :  { %13 = sbr.rel (!%p11_p7) target bundleno = 3 (0x3), region = 75 }

// kernel: transformer_forward.51
= control target key start
LH: loop header
LB: loop body
LE: loop exit
PB: predicated region body
PF: predicated region fallthrough
CT: control target
= control target key end

     0   :  { %vm19_vm0 = vcmask 138240   ;;  %v138_v0 = vmov 0.0   ;;  %vm139_vm1 = vmmov 0   ;;  %vm47_vm2 = vcmask 261120   ;;  %s184_s1 = inlined_call_operand.vmem [shape: bf16[32,17], index: 1, kind: input, shape index: {}]   ;;  %s185_s0 = inlined_call_operand.vmem [shape: bf16[16,32], index: 0, kind: input, shape index: {}]   ;;  %s186_s2 = inlined_call_operand.vmem [shape: f32[1,17], index: 2, kind: input, shape index: {}]   ;;  %s187_s3 = inlined_call_operand.vmem [shape: f32[16,17], index: 3, kind: output, shape index: {}]  }
   0x1   :  { %125 = vmatprep.subr.bf16.mxu0 %v138_v0  ;;  %v135_v1 = vld [vmem:[%s184_s1 + $0x8] sm:$0xff]   ;;  %129 = vmatprep.mubr.msk.bf16.mxu0 %vm139_vm1, %v138_v0  ;;  %20 = vst.msk [vmem:[#allocation2] sm:$0xff] %vm19_vm0, %v138_v0  ;;  %21 = vst.msk [vmem:[#allocation2 + $0x8] sm:$0xff] %vm19_vm0, %v138_v0  ;;  %v136_v2 = vld [vmem:[%s184_s1] sm:$0xff]  }
   0x2   :  { %126 = vmatpush3.bf16.msra.mxu0 %v135_v1  ;;  %v137_v3 = vld [vmem:[%s185_s0] sm:$0xff]  }
   0x3   :  { %127 = vmatprep.subr.bf16.mxu0 %v138_v0  ;;  %v121_v12 = vld [vmem:[%s186_s2] ss:$0 sm:$0xff] }
   0x6   :  { %128 = vmatpush3.bf16.msra.mxu0 %v136_v2 }
   0x8   :  { %v22_v4 = vld [vmem:[#allocation2] sm:$0xff]  ;;  %v23_v8 = vld [vmem:[#allocation2 + $0x8] sm:$0xff] }
   0x9   :  { %130 = vmatmul.mubr.msk.bf16.vlgmr.msra.gmra.mxu0 %vm47_vm2, %v137_v3 }
  0xc9   :  { %v85_v5 = vpop.f32.mrf.mxu0 }
  0xca   :  { %v92_v6 = vadd.f32 %v85_v5, %v22_v4 }
  0xcb   :  { %v131_v7 = vpop.f32.mrf.mxu0 }
  0xcc   :  { %95 = vst.msk [vmem:[#allocation2] sm:$0xff] %vm19_vm0, %v92_v6 }
  0xcd   :  { %v88_v9 = vpop.f32.mrf.mxu0 }
  0xce   :  { %v93_v10 = vadd.f32 %v88_v9, %v23_v8 }
  0xcf   :  { %v132_v11 = vpop.f32.mrf.mxu0 }
  0xd0   :  { %96 = vst.msk [vmem:[#allocation2 + $0x8] sm:$0xff] %vm19_vm0, %v93_v10 }
  0xd3   :  { %v100_v13 = vld [vmem:[#allocation2] sm:$0xff] }
  0xd4   :  { %v109_v14 = vadd.f32 %v121_v12, %v100_v13 }
  0xd6   :  { %111 = vst.msk [vmem:[%s187_s3] sm:$0xff] %vm19_vm0, %v109_v14 }
  0xd7   :  { %v101_v15 = vld [vmem:[#allocation2 + $0x8] sm:$0xff] }
  0xd8   :  { %v110_v16 = vadd.f32 %v121_v12, %v101_v15 }
  0xda   :  { %112 = vst.msk [vmem:[%s187_s3 + $0x8] sm:$0xff] %vm19_vm0, %v110_v16 }

</bundles_post_ra>
